<compile_context>
chip_gen: v7x
topology: tpu7x:2x2x1
jax: 0.10.0
libtpu: 0.0.40
codegen_flags: <defaults>
</compile_context>

<pallas_src>
import functools

import jax
import jax.numpy as jnp
from jax import lax
from jax.experimental import pallas as pl
from jax.experimental.pallas import tpu as pltpu


# -----------------------------------------------------------------------------
# Pallas kernel: full ResNet_1D_CBAM_Block forward for one batch block.
# -----------------------------------------------------------------------------
def _resnet_cbam_kernel(
    x_ref,        # (1, C, B*L)     input block (batch folded into lanes)
    bn1s_ref,     # (C, 1)          gamma1 / sqrt(var1 + eps)
    bn1b_ref,     # (C, 1)          beta1 - mean1 * scale1
    w1_ref,       # (OC, K*C)       conv1 weight, taps fused on contraction axis
    bn2s_ref,     # (OC, 1)
    bn2b_ref,     # (OC, 1)
    w2_ref,       # (OC, K*OC)      conv2 weight, taps fused
    cmask_ref,    # (K, B*L)        per-tap validity mask (zero across batch seams)
    sel_ref,      # (B*L, B*Lh)     even-column selection matrix for maxpool(2,2)
    wfc1_ref,     # (HID, OC)       channel-attention Linear #1 (no bias)
    wfc2_ref,     # (OC, HID)       channel-attention Linear #2 (no bias)
    bcast_ref,    # (B, B*Lh)       per-batch-segment broadcast matrix
    smask_ref,    # (KSA, B*Lh)     spatial-attention per-tap validity mask
    wsa_ref,      # (1, 2*KSA)      spatial-attention conv weight, taps fused
    out_ref,      # (1, OC, B*Lh)
    *,
    K, pad, ksa, B, L, Lh, mxu_dtype,
):
    f32 = jnp.float32
    C = x_ref.shape[1]
    OC = out_ref.shape[1]
    BL = B * L
    BLh = B * Lh

    x = x_ref[0].astype(f32)                                   # (C, BL)

    # --- BN1 (eval) + ReLU; dropout == identity in eval mode -------------------
    h = jnp.maximum(x * bn1s_ref[...] + bn1b_ref[...], 0.0)

    cmask = cmask_ref[...]                                     # (K, BL)

    def conv_fused(act, w_ref):
        # 1-D conv (stride 1, 'same' padding) over each length-L segment of the
        # lane axis.  The K shifted+masked copies of the input are stacked on
        # the contraction (sublane) axis so the whole conv is ONE MXU matmul.
        in_ch = act.shape[0]
        zpad = jnp.zeros((in_ch, pad), f32)
        ap = jnp.concatenate([zpad, act, zpad], axis=1)        # (in_ch, BL+2*pad)
        slabs = [ap[:, k:k + BL] * cmask[k:k + 1, :] for k in range(K)]
        stacked = jnp.concatenate(slabs, axis=0)               # (K*in_ch, BL)
        return jnp.dot(w_ref[...].astype(mxu_dtype),
                       stacked.astype(mxu_dtype),
                       preferred_element_type=f32)             # (OC, BL)

    # --- conv1 -> BN2 (eval) + ReLU -> conv2 ------------------------------------
    acc1 = conv_fused(h, w1_ref)
    h2 = jnp.maximum(acc1 * bn2s_ref[...] + bn2b_ref[...], 0.0)
    acc2 = conv_fused(h2, w2_ref)

    # --- MaxPool1d(2,2) on conv2 output and on raw x (residual path), fused -----
    cat = jnp.concatenate([acc2, x], axis=0)                   # (OC+C, BL)
    nxt = jnp.concatenate(
        [cat[:, 1:], jnp.zeros((cat.shape[0], 1), f32)], axis=1)
    pair_max = jnp.maximum(cat, nxt)                           # even col i: max(i, i+1)
    pooled_both = jnp.dot(pair_max.astype(mxu_dtype),
                          sel_ref[...].astype(mxu_dtype),
                          preferred_element_type=f32)          # (OC+C, BLh)
    pooled = pooled_both[:OC, :]                               # (OC, BLh)
    identity = pooled_both[OC:, :]                             # (C,  BLh)

    # --- CBAM: channel attention (avg & max branches share one FC pass) ---------
    avg_cols, max_cols = [], []
    for b in range(B):
        seg = pooled[:, b * Lh:(b + 1) * Lh]                   # (OC, Lh)
        avg_cols.append(jnp.mean(seg, axis=1, keepdims=True))
        max_cols.append(jnp.max(seg, axis=1, keepdims=True))
    stats = jnp.concatenate(avg_cols + max_cols, axis=1)       # (OC, 2B)
    hid = jnp.maximum(
        jnp.dot(wfc1_ref[...], stats, preferred_element_type=f32), 0.0)
    fc_out = jnp.dot(wfc2_ref[...], hid, preferred_element_type=f32)   # (OC, 2B)
    ca = jax.nn.sigmoid(fc_out[:, :B] + fc_out[:, B:])         # (OC, B)
    ca_full = jnp.dot(ca, bcast_ref[...],
                      preferred_element_type=f32)              # (OC, BLh)
    x_ca = ca_full * pooled

    # --- CBAM: spatial attention (ksa-tap conv fused into one matmul) -----------
    avg_c = jnp.mean(x_ca, axis=0, keepdims=True)              # (1, BLh)
    max_c = jnp.max(x_ca, axis=0, keepdims=True)               # (1, BLh)
    cat_sa = jnp.concatenate([avg_c, max_c], axis=0)           # (2, BLh)
    sp = ksa // 2
    zs = jnp.zeros((2, sp), f32)
    sa_pad = jnp.concatenate([zs, cat_sa, zs], axis=1)         # (2, BLh+2*sp)
    smask = smask_ref[...]                                     # (ksa, BLh)
    sa_slabs = [sa_pad[:, k:k + BLh] * smask[k:k + 1, :] for k in range(ksa)]
    sa_stacked = jnp.concatenate(sa_slabs, axis=0)             # (2*ksa, BLh)
    sa_logit = jnp.dot(wsa_ref[...], sa_stacked,
                       preferred_element_type=f32)             # (1, BLh)
    sa = jax.nn.sigmoid(sa_logit)

    # --- residual add; lane-dense (OC, B*Lh) store -------------------------------
    out_ref[0] = (sa * x_ca + identity).astype(out_ref.dtype)


# -----------------------------------------------------------------------------
# Wrapper: parameter folding + constant precompute + pallas_call.
# -----------------------------------------------------------------------------
def resnet_1d_cbam_block(x, params, *, kernel_size, stride, padding,
                         downsampling, batch_block=4, eps=1e-5,
                         mxu_dtype=jnp.float32):
    # Note: set mxu_dtype=jnp.bfloat16 on v6e/v7x for 2x MXU rate (looser check).
    assert stride == 1, "kernel implemented for stride=1 (length-preserving conv)"
    assert kernel_size % 2 == 1 and padding == kernel_size // 2
    assert downsampling, "residual add requires downsampling=True here"

    N, C, L = x.shape
    OC = params["w_conv1"].shape[0]
    HID = params["w_fc1"].shape[0]
    ksa = params["w_sa"].shape[-1]
    assert C == OC and L % 2 == 0
    Lh = L // 2
    K = kernel_size
    f32 = jnp.float32

    # Batch blocking: fold B batch elements into the matmul lane dimension.
    B = max(1, min(batch_block, N))
    while N % B:
        B -= 1
    NB = N // B
    BL, BLh = B * L, B * Lh

    # Fold BatchNorm (eval mode) into per-channel scale/shift.
    s1 = params["gamma1"] / jnp.sqrt(params["var1"] + eps)
    b1 = params["beta1"] - params["mean1"] * s1
    s2 = params["gamma2"] / jnp.sqrt(params["var2"] + eps)
    b2 = params["beta2"] - params["mean2"] * s2
    bn1_scale = s1.reshape(C, 1).astype(f32)
    bn1_shift = b1.reshape(C, 1).astype(f32)
    bn2_scale = s2.reshape(OC, 1).astype(f32)
    bn2_shift = b2.reshape(OC, 1).astype(f32)

    # Fuse the K conv taps into one contraction: w_fused[:, k*C + c] = W[:, c, k].
    w1_f = jnp.transpose(params["w_conv1"], (0, 2, 1)).reshape(OC, K * C).astype(f32)
    w2_f = jnp.transpose(params["w_conv2"], (0, 2, 1)).reshape(OC, K * OC).astype(f32)
    w_fc1 = params["w_fc1"].astype(f32)                                  # (HID, OC)
    w_fc2 = params["w_fc2"].astype(f32)                                  # (OC, HID)
    w_sa_f = jnp.transpose(params["w_sa"][0], (1, 0)).reshape(1, 2 * ksa).astype(f32)

    # Precomputed constants (hoisted out of the kernel).
    pos_l = jnp.arange(BL) % L
    koff = jnp.arange(K)[:, None] - padding
    cmask = ((pos_l[None, :] + koff >= 0) &
             (pos_l[None, :] + koff < L)).astype(f32)            # (K, BL)

    pos_h = jnp.arange(BLh) % Lh
    soff = jnp.arange(ksa)[:, None] - ksa // 2
    smask = ((pos_h[None, :] + soff >= 0) &
             (pos_h[None, :] + soff < Lh)).astype(f32)           # (ksa, BLh)

    sel_even = (jnp.arange(BL)[:, None]
                == 2 * jnp.arange(BLh)[None, :]).astype(f32)     # (BL, BLh)
    bcast = (jnp.arange(B)[:, None]
             == (jnp.arange(BLh) // Lh)[None, :]).astype(f32)    # (B, BLh)

    # Flatten batch block into the lane axis (keep x in its own dtype).
    x_blk = x.reshape(NB, B, C, L).transpose(0, 2, 1, 3).reshape(NB, C, BL)

    kernel = functools.partial(_resnet_cbam_kernel, K=K, pad=padding, ksa=ksa,
                               B=B, L=L, Lh=Lh, mxu_dtype=mxu_dtype)

    def full_spec(shape):
        nd = len(shape)
        return pl.BlockSpec(shape, lambda n, _nd=nd: (0,) * _nd)

    out = pl.pallas_call(
        kernel,
        out_shape=jax.ShapeDtypeStruct((NB, OC, BLh), f32),
        grid=(NB,),
        in_specs=[
            pl.BlockSpec((1, C, BL), lambda n: (n, 0, 0)),   # x batch block
            full_spec((C, 1)),                               # bn1 scale
            full_spec((C, 1)),                               # bn1 shift
            full_spec((OC, K * C)),                          # fused conv1 weight
            full_spec((OC, 1)),                              # bn2 scale
            full_spec((OC, 1)),                              # bn2 shift
            full_spec((OC, K * OC)),                         # fused conv2 weight
            full_spec((K, BL)),                              # conv tap masks
            full_spec((BL, BLh)),                            # maxpool even-selection
            full_spec((HID, OC)),                            # fc1 weight
            full_spec((OC, HID)),                            # fc2 weight
            full_spec((B, BLh)),                             # segment broadcast
            full_spec((ksa, BLh)),                           # spatial-attn tap masks
            full_spec((1, 2 * ksa)),                         # spatial-attn weight
        ],
        out_specs=pl.BlockSpec((1, OC, BLh), lambda n: (n, 0, 0)),
        compiler_params=pltpu.CompilerParams(
            dimension_semantics=("parallel",)),
    )(x_blk, bn1_scale, bn1_shift, w1_f, bn2_scale, bn2_shift, w2_f,
      cmask, sel_even, w_fc1, w_fc2, bcast, smask, w_sa_f)

    # (NB, OC, B*Lh) -> (N, OC, Lh)
    return out.reshape(NB, OC, B, Lh).transpose(0, 2, 1, 3).reshape(N, OC, Lh)


# -----------------------------------------------------------------------------
# Pure-JAX reference (eval-mode PyTorch semantics) for verification.
# -----------------------------------------------------------------------------
def _ref_forward(x, p, *, kernel_size, stride, padding, downsampling, eps=1e-5):
    s1 = p["gamma1"] / jnp.sqrt(p["var1"] + eps)
    b1 = p["beta1"] - p["mean1"] * s1
    h = jnp.maximum(x * s1[None, :, None] + b1[None, :, None], 0.0)
    h = lax.conv_general_dilated(h, p["w_conv1"], (stride,),
                                 [(padding, padding)],
                                 dimension_numbers=("NCH", "OIH", "NCH"))
    s2 = p["gamma2"] / jnp.sqrt(p["var2"] + eps)
    b2 = p["beta2"] - p["mean2"] * s2
    h = jnp.maximum(h * s2[None, :, None] + b2[None, :, None], 0.0)
    h = lax.conv_general_dilated(h, p["w_conv2"], (stride,),
                                 [(padding, padding)],
                                 dimension_numbers=("NCH", "OIH", "NCH"))
    pooled = lax.reduce_window(h, -jnp.inf, lax.max, (1, 1, 2), (1, 1, 2), "VALID")

    # channel attention
    def fc(v):  # v: (N, OC)
        return jnp.maximum(v @ p["w_fc1"].T, 0.0) @ p["w_fc2"].T
    ca = jax.nn.sigmoid(fc(pooled.mean(-1)) + fc(pooled.max(-1)))[:, :, None]
    x_ca = ca * pooled

    # spatial attention
    ksa = p["w_sa"].shape[-1]
    cat = jnp.concatenate(
        [x_ca.mean(1, keepdims=True), x_ca.max(1, keepdims=True)], axis=1)
    sa = lax.conv_general_dilated(cat, p["w_sa"], (1,),
                                  [(ksa // 2, ksa // 2)],
                                  dimension_numbers=("NCH", "OIH", "NCH"))
    out = jax.nn.sigmoid(sa) * x_ca

    identity = lax.reduce_window(x, -jnp.inf, lax.max, (1, 1, 2), (1, 1, 2),
                                 "VALID") if downsampling else x
    return out + identity


# -----------------------------------------------------------------------------
if __name__ == "__main__":
    # Small, forward-consistent shapes (in_channels == out_channels).
    N, C, L = 8, 16, 64
    K, STRIDE, PAD = 3, 1, 1
    RED = 4                       # reduction_ratio -> hidden = 4
    KSA = 7
    HID = C // RED

    key = jax.random.PRNGKey(0)
    ks = jax.random.split(key, 12)
    f32 = jnp.float32

    params = {
        "gamma1": 1.0 + 0.1 * jax.random.normal(ks[0], (C,), f32),
        "beta1": 0.1 * jax.random.normal(ks[1], (C,), f32),
        "mean1": 0.1 * jax.random.normal(ks[2], (C,), f32),
        "var1": 1.0 + 0.1 * jnp.abs(jax.random.normal(ks[3], (C,), f32)),
        "w_conv1": 0.2 * jax.random.normal(ks[4], (C, C, K), f32),
        "gamma2": 1.0 + 0.1 * jax.random.normal(ks[5], (C,), f32),
        "beta2": 0.1 * jax.random.normal(ks[6], (C,), f32),
        "mean2": 0.1 * jax.random.normal(ks[7], (C,), f32),
        "var2": 1.0 + 0.1 * jnp.abs(jax.random.normal(ks[8], (C,), f32)),
        "w_conv2": 0.2 * jax.random.normal(ks[9], (C, C, K), f32),
        "w_fc1": 0.3 * jax.random.normal(ks[10], (HID, C), f32),
        "w_fc2": 0.3 * jax.random.normal(ks[11], (C, HID), f32),
        "w_sa": 0.3 * jax.random.normal(jax.random.fold_in(key, 99),
                                        (1, 2, KSA), f32),
    }

    x = jax.random.normal(jax.random.fold_in(key, 123), (N, C, L), f32)

    out = resnet_1d_cbam_block(x, params, kernel_size=K, stride=STRIDE,
                               padding=PAD, downsampling=True, batch_block=4)
    out = jax.block_until_ready(out)

    ref = _ref_forward(x, params, kernel_size=K, stride=STRIDE, padding=PAD,
                       downsampling=True)
    ref = jax.block_until_ready(ref)

    assert out.shape == (N, C, L // 2), out.shape
    assert jnp.allclose(out, ref, rtol=1e-3, atol=1e-3), (
        float(jnp.max(jnp.abs(out - ref))))

    print("KERNEL_OK")
</pallas_src>

<mosaic_0001>
module attributes {stable_mosaic.version = 11 : i64} {
  func.func @_resnet_cbam_kernel(%arg0: i32, %arg1: memref<1x16x256xf32, #tpu.memory_space<vmem>>, %arg2: memref<16x1xf32, #tpu.memory_space<vmem>>, %arg3: memref<16x1xf32, #tpu.memory_space<vmem>>, %arg4: memref<16x48xf32, #tpu.memory_space<vmem>>, %arg5: memref<16x1xf32, #tpu.memory_space<vmem>>, %arg6: memref<16x1xf32, #tpu.memory_space<vmem>>, %arg7: memref<16x48xf32, #tpu.memory_space<vmem>>, %arg8: memref<3x256xf32, #tpu.memory_space<vmem>>, %arg9: memref<256x128xf32, #tpu.memory_space<vmem>>, %arg10: memref<4x16xf32, #tpu.memory_space<vmem>>, %arg11: memref<16x4xf32, #tpu.memory_space<vmem>>, %arg12: memref<4x128xf32, #tpu.memory_space<vmem>>, %arg13: memref<7x128xf32, #tpu.memory_space<vmem>>, %arg14: memref<1x14xf32, #tpu.memory_space<vmem>>, %arg15: memref<1x16x128xf32, #tpu.memory_space<vmem>>) attributes {dimension_semantics = [#tpu.dimension_semantics<parallel>], iteration_bounds = array<i64: 2>, scalar_prefetch = 0 : i64, scratch_operands = 0 : i64, tpu.core_type = #tpu.core_type<tc>, window_params = [{transform_indices = @transform_0, window_bounds = array<i64: 1, 16, 256>}, {pipeline_mode = #tpu.pipeline_mode<synchronous>, transform_indices = @transform_1, window_bounds = array<i64: 16, 1>}, {pipeline_mode = #tpu.pipeline_mode<synchronous>, transform_indices = @transform_2, window_bounds = array<i64: 16, 1>}, {pipeline_mode = #tpu.pipeline_mode<synchronous>, transform_indices = @transform_3, window_bounds = array<i64: 16, 48>}, {pipeline_mode = #tpu.pipeline_mode<synchronous>, transform_indices = @transform_4, window_bounds = array<i64: 16, 1>}, {pipeline_mode = #tpu.pipeline_mode<synchronous>, transform_indices = @transform_5, window_bounds = array<i64: 16, 1>}, {pipeline_mode = #tpu.pipeline_mode<synchronous>, transform_indices = @transform_6, window_bounds = array<i64: 16, 48>}, {pipeline_mode = #tpu.pipeline_mode<synchronous>, transform_indices = @transform_7, window_bounds = array<i64: 3, 256>}, {pipeline_mode = #tpu.pipeline_mode<synchronous>, transform_indices = @transform_8, window_bounds = array<i64: 256, 128>}, {pipeline_mode = #tpu.pipeline_mode<synchronous>, transform_indices = @transform_9, window_bounds = array<i64: 4, 16>}, {pipeline_mode = #tpu.pipeline_mode<synchronous>, transform_indices = @transform_10, window_bounds = array<i64: 16, 4>}, {pipeline_mode = #tpu.pipeline_mode<synchronous>, transform_indices = @transform_11, window_bounds = array<i64: 4, 128>}, {pipeline_mode = #tpu.pipeline_mode<synchronous>, transform_indices = @transform_12, window_bounds = array<i64: 7, 128>}, {pipeline_mode = #tpu.pipeline_mode<synchronous>, transform_indices = @transform_13, window_bounds = array<i64: 1, 14>}, {transform_indices = @transform_14, window_bounds = array<i64: 1, 16, 128>}]} {
    %c0 = arith.constant 0 : index
    %c0_0 = arith.constant 0 : index
    %c0_1 = arith.constant 0 : index
    %0 = vector.load %arg1[%c0, %c0_0, %c0_1] : memref<1x16x256xf32, #tpu.memory_space<vmem>>, vector<1x16x256xf32>
    %1 = vector.shape_cast %0 : vector<1x16x256xf32> to vector<16x256xf32>
    %c0_2 = arith.constant 0 : index
    %c0_3 = arith.constant 0 : index
    %2 = vector.load %arg2[%c0_2, %c0_3] : memref<16x1xf32, #tpu.memory_space<vmem>>, vector<16x1xf32>
    %3 = vector.broadcast %2 : vector<16x1xf32> to vector<16x256xf32>
    %4 = arith.mulf %1, %3 : vector<16x256xf32>
    %c0_4 = arith.constant 0 : index
    %c0_5 = arith.constant 0 : index
    %5 = vector.load %arg3[%c0_4, %c0_5] : memref<16x1xf32, #tpu.memory_space<vmem>>, vector<16x1xf32>
    %6 = vector.broadcast %5 : vector<16x1xf32> to vector<16x256xf32>
    %7 = arith.addf %4, %6 : vector<16x256xf32>
    %cst = arith.constant 0.000000e+00 : f32
    %8 = vector.broadcast %cst : f32 to vector<16x256xf32>
    %9 = arith.maximumf %7, %8 : vector<16x256xf32>
    %c0_6 = arith.constant 0 : index
    %c0_7 = arith.constant 0 : index
    %10 = vector.load %arg8[%c0_6, %c0_7] : memref<3x256xf32, #tpu.memory_space<vmem>>, vector<3x256xf32>
    %cst_8 = arith.constant 0.000000e+00 : f32
    %11 = vector.broadcast %cst_8 : f32 to vector<16x1xf32>
    %12 = tpu.concatenate %11, %9, %11 in 1 : vector<16x1xf32>, vector<16x256xf32>, vector<16x1xf32> -> vector<16x258xf32>
    %13 = vector.extract_strided_slice %12 {offsets = [0, 0], sizes = [16, 256], strides = [1, 1]} : vector<16x258xf32> to vector<16x256xf32>
    %14 = vector.extract_strided_slice %10 {offsets = [0, 0], sizes = [1, 256], strides = [1, 1]} : vector<3x256xf32> to vector<1x256xf32>
    %15 = vector.broadcast %14 : vector<1x256xf32> to vector<16x256xf32>
    %16 = arith.mulf %13, %15 : vector<16x256xf32>
    %17 = vector.extract_strided_slice %12 {offsets = [0, 1], sizes = [16, 256], strides = [1, 1]} : vector<16x258xf32> to vector<16x256xf32>
    %18 = vector.extract_strided_slice %10 {offsets = [1, 0], sizes = [1, 256], strides = [1, 1]} : vector<3x256xf32> to vector<1x256xf32>
    %19 = vector.broadcast %18 : vector<1x256xf32> to vector<16x256xf32>
    %20 = arith.mulf %17, %19 : vector<16x256xf32>
    %21 = vector.extract_strided_slice %12 {offsets = [0, 2], sizes = [16, 256], strides = [1, 1]} : vector<16x258xf32> to vector<16x256xf32>
    %22 = vector.extract_strided_slice %10 {offsets = [2, 0], sizes = [1, 256], strides = [1, 1]} : vector<3x256xf32> to vector<1x256xf32>
    %23 = vector.broadcast %22 : vector<1x256xf32> to vector<16x256xf32>
    %24 = arith.mulf %21, %23 : vector<16x256xf32>
    %25 = tpu.concatenate %16, %20, %24 in 0 : vector<16x256xf32>, vector<16x256xf32>, vector<16x256xf32> -> vector<48x256xf32>
    %c0_9 = arith.constant 0 : index
    %c0_10 = arith.constant 0 : index
    %26 = vector.load %arg4[%c0_9, %c0_10] : memref<16x48xf32, #tpu.memory_space<vmem>>, vector<16x48xf32>
    %cst_11 = arith.constant dense<0.000000e+00> : vector<16x256xf32>
    %27 = tpu.matmul %26, %25, %cst_11 {dimension_numbers = #tpu.dot_dimension_numbers<[1], [0], [0], [1], [0, 0, 1, 1], [], []>} : vector<16x48xf32>, vector<48x256xf32>, vector<16x256xf32> -> vector<16x256xf32>
    %c0_12 = arith.constant 0 : index
    %c0_13 = arith.constant 0 : index
    %28 = vector.load %arg5[%c0_12, %c0_13] : memref<16x1xf32, #tpu.memory_space<vmem>>, vector<16x1xf32>
    %29 = vector.broadcast %28 : vector<16x1xf32> to vector<16x256xf32>
    %30 = arith.mulf %27, %29 : vector<16x256xf32>
    %c0_14 = arith.constant 0 : index
    %c0_15 = arith.constant 0 : index
    %31 = vector.load %arg6[%c0_14, %c0_15] : memref<16x1xf32, #tpu.memory_space<vmem>>, vector<16x1xf32>
    %32 = vector.broadcast %31 : vector<16x1xf32> to vector<16x256xf32>
    %33 = arith.addf %30, %32 : vector<16x256xf32>
    %cst_16 = arith.constant 0.000000e+00 : f32
    %34 = vector.broadcast %cst_16 : f32 to vector<16x256xf32>
    %35 = arith.maximumf %33, %34 : vector<16x256xf32>
    %cst_17 = arith.constant 0.000000e+00 : f32
    %36 = vector.broadcast %cst_17 : f32 to vector<16x1xf32>
    %37 = tpu.concatenate %36, %35, %36 in 1 : vector<16x1xf32>, vector<16x256xf32>, vector<16x1xf32> -> vector<16x258xf32>
    %38 = vector.extract_strided_slice %37 {offsets = [0, 0], sizes = [16, 256], strides = [1, 1]} : vector<16x258xf32> to vector<16x256xf32>
    %39 = vector.extract_strided_slice %10 {offsets = [0, 0], sizes = [1, 256], strides = [1, 1]} : vector<3x256xf32> to vector<1x256xf32>
    %40 = vector.broadcast %39 : vector<1x256xf32> to vector<16x256xf32>
    %41 = arith.mulf %38, %40 : vector<16x256xf32>
    %42 = vector.extract_strided_slice %37 {offsets = [0, 1], sizes = [16, 256], strides = [1, 1]} : vector<16x258xf32> to vector<16x256xf32>
    %43 = vector.extract_strided_slice %10 {offsets = [1, 0], sizes = [1, 256], strides = [1, 1]} : vector<3x256xf32> to vector<1x256xf32>
    %44 = vector.broadcast %43 : vector<1x256xf32> to vector<16x256xf32>
    %45 = arith.mulf %42, %44 : vector<16x256xf32>
    %46 = vector.extract_strided_slice %37 {offsets = [0, 2], sizes = [16, 256], strides = [1, 1]} : vector<16x258xf32> to vector<16x256xf32>
    %47 = vector.extract_strided_slice %10 {offsets = [2, 0], sizes = [1, 256], strides = [1, 1]} : vector<3x256xf32> to vector<1x256xf32>
    %48 = vector.broadcast %47 : vector<1x256xf32> to vector<16x256xf32>
    %49 = arith.mulf %46, %48 : vector<16x256xf32>
    %50 = tpu.concatenate %41, %45, %49 in 0 : vector<16x256xf32>, vector<16x256xf32>, vector<16x256xf32> -> vector<48x256xf32>
    %c0_18 = arith.constant 0 : index
    %c0_19 = arith.constant 0 : index
    %51 = vector.load %arg7[%c0_18, %c0_19] : memref<16x48xf32, #tpu.memory_space<vmem>>, vector<16x48xf32>
    %cst_20 = arith.constant dense<0.000000e+00> : vector<16x256xf32>
    %52 = tpu.matmul %51, %50, %cst_20 {dimension_numbers = #tpu.dot_dimension_numbers<[1], [0], [0], [1], [0, 0, 1, 1], [], []>} : vector<16x48xf32>, vector<48x256xf32>, vector<16x256xf32> -> vector<16x256xf32>
    %53 = tpu.concatenate %52, %1 in 0 : vector<16x256xf32>, vector<16x256xf32> -> vector<32x256xf32>
    %54 = vector.extract_strided_slice %53 {offsets = [0, 1], sizes = [32, 255], strides = [1, 1]} : vector<32x256xf32> to vector<32x255xf32>
    %cst_21 = arith.constant 0.000000e+00 : f32
    %55 = vector.broadcast %cst_21 : f32 to vector<32x1xf32>
    %56 = tpu.concatenate %54, %55 in 1 : vector<32x255xf32>, vector<32x1xf32> -> vector<32x256xf32>
    %57 = arith.maximumf %53, %56 : vector<32x256xf32>
    %c0_22 = arith.constant 0 : index
    %c0_23 = arith.constant 0 : index
    %58 = vector.load %arg9[%c0_22, %c0_23] : memref<256x128xf32, #tpu.memory_space<vmem>>, vector<256x128xf32>
    %cst_24 = arith.constant dense<0.000000e+00> : vector<32x128xf32>
    %59 = tpu.matmul %57, %58, %cst_24 {dimension_numbers = #tpu.dot_dimension_numbers<[1], [0], [0], [1], [0, 0, 1, 1], [], []>} : vector<32x256xf32>, vector<256x128xf32>, vector<32x128xf32> -> vector<32x128xf32>
    %60 = vector.extract_strided_slice %59 {offsets = [0, 0], sizes = [16, 128], strides = [1, 1]} : vector<32x128xf32> to vector<16x128xf32>
    %61 = vector.extract_strided_slice %59 {offsets = [16, 0], sizes = [16, 128], strides = [1, 1]} : vector<32x128xf32> to vector<16x128xf32>
    %62 = vector.extract_strided_slice %60 {offsets = [0, 0], sizes = [16, 32], strides = [1, 1]} : vector<16x128xf32> to vector<16x32xf32>
    %cst_25 = arith.constant dense<0.000000e+00> : vector<16xf32>
    %63 = vector.multi_reduction <add>, %62, %cst_25 [1] : vector<16x32xf32> to vector<16xf32>
    %64 = vector.shape_cast %63 : vector<16xf32> to vector<16x1xf32>
    %cst_26 = arith.constant 3.200000e+01 : f32
    %65 = vector.broadcast %cst_26 : f32 to vector<16x1xf32>
    %66 = arith.divf %64, %65 : vector<16x1xf32>
    %cst_27 = arith.constant dense<0xFF800000> : vector<16xf32>
    %67 = vector.multi_reduction <maximumf>, %62, %cst_27 [1] : vector<16x32xf32> to vector<16xf32>
    %68 = vector.shape_cast %67 : vector<16xf32> to vector<16x1xf32>
    %69 = vector.extract_strided_slice %60 {offsets = [0, 32], sizes = [16, 32], strides = [1, 1]} : vector<16x128xf32> to vector<16x32xf32>
    %cst_28 = arith.constant dense<0.000000e+00> : vector<16xf32>
    %70 = vector.multi_reduction <add>, %69, %cst_28 [1] : vector<16x32xf32> to vector<16xf32>
    %71 = vector.shape_cast %70 : vector<16xf32> to vector<16x1xf32>
    %cst_29 = arith.constant 3.200000e+01 : f32
    %72 = vector.broadcast %cst_29 : f32 to vector<16x1xf32>
    %73 = arith.divf %71, %72 : vector<16x1xf32>
    %cst_30 = arith.constant dense<0xFF800000> : vector<16xf32>
    %74 = vector.multi_reduction <maximumf>, %69, %cst_30 [1] : vector<16x32xf32> to vector<16xf32>
    %75 = vector.shape_cast %74 : vector<16xf32> to vector<16x1xf32>
    %76 = vector.extract_strided_slice %60 {offsets = [0, 64], sizes = [16, 32], strides = [1, 1]} : vector<16x128xf32> to vector<16x32xf32>
    %cst_31 = arith.constant dense<0.000000e+00> : vector<16xf32>
    %77 = vector.multi_reduction <add>, %76, %cst_31 [1] : vector<16x32xf32> to vector<16xf32>
    %78 = vector.shape_cast %77 : vector<16xf32> to vector<16x1xf32>
    %cst_32 = arith.constant 3.200000e+01 : f32
    %79 = vector.broadcast %cst_32 : f32 to vector<16x1xf32>
    %80 = arith.divf %78, %79 : vector<16x1xf32>
    %cst_33 = arith.constant dense<0xFF800000> : vector<16xf32>
    %81 = vector.multi_reduction <maximumf>, %76, %cst_33 [1] : vector<16x32xf32> to vector<16xf32>
    %82 = vector.shape_cast %81 : vector<16xf32> to vector<16x1xf32>
    %83 = vector.extract_strided_slice %60 {offsets = [0, 96], sizes = [16, 32], strides = [1, 1]} : vector<16x128xf32> to vector<16x32xf32>
    %cst_34 = arith.constant dense<0.000000e+00> : vector<16xf32>
    %84 = vector.multi_reduction <add>, %83, %cst_34 [1] : vector<16x32xf32> to vector<16xf32>
    %85 = vector.shape_cast %84 : vector<16xf32> to vector<16x1xf32>
    %cst_35 = arith.constant 3.200000e+01 : f32
    %86 = vector.broadcast %cst_35 : f32 to vector<16x1xf32>
    %87 = arith.divf %85, %86 : vector<16x1xf32>
    %cst_36 = arith.constant dense<0xFF800000> : vector<16xf32>
    %88 = vector.multi_reduction <maximumf>, %83, %cst_36 [1] : vector<16x32xf32> to vector<16xf32>
    %89 = vector.shape_cast %88 : vector<16xf32> to vector<16x1xf32>
    %90 = tpu.concatenate %66, %73, %80, %87, %68, %75, %82, %89 in 1 : vector<16x1xf32>, vector<16x1xf32>, vector<16x1xf32>, vector<16x1xf32>, vector<16x1xf32>, vector<16x1xf32>, vector<16x1xf32>, vector<16x1xf32> -> vector<16x8xf32>
    %c0_37 = arith.constant 0 : index
    %c0_38 = arith.constant 0 : index
    %91 = vector.load %arg10[%c0_37, %c0_38] : memref<4x16xf32, #tpu.memory_space<vmem>>, vector<4x16xf32>
    %cst_39 = arith.constant dense<0.000000e+00> : vector<4x8xf32>
    %92 = tpu.matmul %91, %90, %cst_39 {dimension_numbers = #tpu.dot_dimension_numbers<[1], [0], [0], [1], [0, 0, 1, 1], [], []>} : vector<4x16xf32>, vector<16x8xf32>, vector<4x8xf32> -> vector<4x8xf32>
    %cst_40 = arith.constant 0.000000e+00 : f32
    %93 = vector.broadcast %cst_40 : f32 to vector<4x8xf32>
    %94 = arith.maximumf %92, %93 : vector<4x8xf32>
    %c0_41 = arith.constant 0 : index
    %c0_42 = arith.constant 0 : index
    %95 = vector.load %arg11[%c0_41, %c0_42] : memref<16x4xf32, #tpu.memory_space<vmem>>, vector<16x4xf32>
    %cst_43 = arith.constant dense<0.000000e+00> : vector<16x8xf32>
    %96 = tpu.matmul %95, %94, %cst_43 {dimension_numbers = #tpu.dot_dimension_numbers<[1], [0], [0], [1], [0, 0, 1, 1], [], []>} : vector<16x4xf32>, vector<4x8xf32>, vector<16x8xf32> -> vector<16x8xf32>
    %97 = vector.extract_strided_slice %96 {offsets = [0, 0], sizes = [16, 4], strides = [1, 1]} : vector<16x8xf32> to vector<16x4xf32>
    %98 = vector.extract_strided_slice %96 {offsets = [0, 4], sizes = [16, 4], strides = [1, 1]} : vector<16x8xf32> to vector<16x4xf32>
    %99 = arith.addf %97, %98 : vector<16x4xf32>
    %100 = arith.negf %99 : vector<16x4xf32>
    %101 = math.exp %100 : vector<16x4xf32>
    %cst_44 = arith.constant 1.000000e+00 : f32
    %102 = vector.broadcast %cst_44 : f32 to vector<16x4xf32>
    %103 = arith.addf %102, %101 : vector<16x4xf32>
    %104 = arith.divf %102, %103 : vector<16x4xf32>
    %c0_45 = arith.constant 0 : index
    %c0_46 = arith.constant 0 : index
    %105 = vector.load %arg12[%c0_45, %c0_46] : memref<4x128xf32, #tpu.memory_space<vmem>>, vector<4x128xf32>
    %cst_47 = arith.constant dense<0.000000e+00> : vector<16x128xf32>
    %106 = tpu.matmul %104, %105, %cst_47 {dimension_numbers = #tpu.dot_dimension_numbers<[1], [0], [0], [1], [0, 0, 1, 1], [], []>} : vector<16x4xf32>, vector<4x128xf32>, vector<16x128xf32> -> vector<16x128xf32>
    %107 = arith.mulf %106, %60 : vector<16x128xf32>
    %cst_48 = arith.constant dense<0.000000e+00> : vector<128xf32>
    %108 = vector.multi_reduction <add>, %107, %cst_48 [0] : vector<16x128xf32> to vector<128xf32>
    %109 = vector.shape_cast %108 : vector<128xf32> to vector<1x128xf32>
    %cst_49 = arith.constant 1.600000e+01 : f32
    %110 = vector.broadcast %cst_49 : f32 to vector<1x128xf32>
    %111 = arith.divf %109, %110 : vector<1x128xf32>
    %cst_50 = arith.constant dense<0xFF800000> : vector<128xf32>
    %112 = vector.multi_reduction <maximumf>, %107, %cst_50 [0] : vector<16x128xf32> to vector<128xf32>
    %113 = vector.shape_cast %112 : vector<128xf32> to vector<1x128xf32>
    %114 = tpu.concatenate %111, %113 in 0 : vector<1x128xf32>, vector<1x128xf32> -> vector<2x128xf32>
    %cst_51 = arith.constant 0.000000e+00 : f32
    %115 = vector.broadcast %cst_51 : f32 to vector<2x3xf32>
    %116 = tpu.concatenate %115, %114, %115 in 1 : vector<2x3xf32>, vector<2x128xf32>, vector<2x3xf32> -> vector<2x134xf32>
    %c0_52 = arith.constant 0 : index
    %c0_53 = arith.constant 0 : index
    %117 = vector.load %arg13[%c0_52, %c0_53] : memref<7x128xf32, #tpu.memory_space<vmem>>, vector<7x128xf32>
    %118 = vector.extract_strided_slice %116 {offsets = [0, 0], sizes = [2, 128], strides = [1, 1]} : vector<2x134xf32> to vector<2x128xf32>
    %119 = vector.extract_strided_slice %117 {offsets = [0, 0], sizes = [1, 128], strides = [1, 1]} : vector<7x128xf32> to vector<1x128xf32>
    %120 = vector.broadcast %119 : vector<1x128xf32> to vector<2x128xf32>
    %121 = arith.mulf %118, %120 : vector<2x128xf32>
    %122 = vector.extract_strided_slice %116 {offsets = [0, 1], sizes = [2, 128], strides = [1, 1]} : vector<2x134xf32> to vector<2x128xf32>
    %123 = vector.extract_strided_slice %117 {offsets = [1, 0], sizes = [1, 128], strides = [1, 1]} : vector<7x128xf32> to vector<1x128xf32>
    %124 = vector.broadcast %123 : vector<1x128xf32> to vector<2x128xf32>
    %125 = arith.mulf %122, %124 : vector<2x128xf32>
    %126 = vector.extract_strided_slice %116 {offsets = [0, 2], sizes = [2, 128], strides = [1, 1]} : vector<2x134xf32> to vector<2x128xf32>
    %127 = vector.extract_strided_slice %117 {offsets = [2, 0], sizes = [1, 128], strides = [1, 1]} : vector<7x128xf32> to vector<1x128xf32>
    %128 = vector.broadcast %127 : vector<1x128xf32> to vector<2x128xf32>
    %129 = arith.mulf %126, %128 : vector<2x128xf32>
    %130 = vector.extract_strided_slice %116 {offsets = [0, 3], sizes = [2, 128], strides = [1, 1]} : vector<2x134xf32> to vector<2x128xf32>
    %131 = vector.extract_strided_slice %117 {offsets = [3, 0], sizes = [1, 128], strides = [1, 1]} : vector<7x128xf32> to vector<1x128xf32>
    %132 = vector.broadcast %131 : vector<1x128xf32> to vector<2x128xf32>
    %133 = arith.mulf %130, %132 : vector<2x128xf32>
    %134 = vector.extract_strided_slice %116 {offsets = [0, 4], sizes = [2, 128], strides = [1, 1]} : vector<2x134xf32> to vector<2x128xf32>
    %135 = vector.extract_strided_slice %117 {offsets = [4, 0], sizes = [1, 128], strides = [1, 1]} : vector<7x128xf32> to vector<1x128xf32>
    %136 = vector.broadcast %135 : vector<1x128xf32> to vector<2x128xf32>
    %137 = arith.mulf %134, %136 : vector<2x128xf32>
    %138 = vector.extract_strided_slice %116 {offsets = [0, 5], sizes = [2, 128], strides = [1, 1]} : vector<2x134xf32> to vector<2x128xf32>
    %139 = vector.extract_strided_slice %117 {offsets = [5, 0], sizes = [1, 128], strides = [1, 1]} : vector<7x128xf32> to vector<1x128xf32>
    %140 = vector.broadcast %139 : vector<1x128xf32> to vector<2x128xf32>
    %141 = arith.mulf %138, %140 : vector<2x128xf32>
    %142 = vector.extract_strided_slice %116 {offsets = [0, 6], sizes = [2, 128], strides = [1, 1]} : vector<2x134xf32> to vector<2x128xf32>
    %143 = vector.extract_strided_slice %117 {offsets = [6, 0], sizes = [1, 128], strides = [1, 1]} : vector<7x128xf32> to vector<1x128xf32>
    %144 = vector.broadcast %143 : vector<1x128xf32> to vector<2x128xf32>
    %145 = arith.mulf %142, %144 : vector<2x128xf32>
    %146 = tpu.concatenate %121, %125, %129, %133, %137, %141, %145 in 0 : vector<2x128xf32>, vector<2x128xf32>, vector<2x128xf32>, vector<2x128xf32>, vector<2x128xf32>, vector<2x128xf32>, vector<2x128xf32> -> vector<14x128xf32>
    %c0_54 = arith.constant 0 : index
    %c0_55 = arith.constant 0 : index
    %147 = vector.load %arg14[%c0_54, %c0_55] : memref<1x14xf32, #tpu.memory_space<vmem>>, vector<1x14xf32>
    %cst_56 = arith.constant dense<0.000000e+00> : vector<1x128xf32>
    %148 = tpu.matmul %147, %146, %cst_56 {dimension_numbers = #tpu.dot_dimension_numbers<[1], [0], [0], [1], [0, 0, 1, 1], [], []>} : vector<1x14xf32>, vector<14x128xf32>, vector<1x128xf32> -> vector<1x128xf32>
    %149 = arith.negf %148 : vector<1x128xf32>
    %150 = math.exp %149 : vector<1x128xf32>
    %cst_57 = arith.constant 1.000000e+00 : f32
    %151 = vector.broadcast %cst_57 : f32 to vector<1x128xf32>
    %152 = arith.addf %151, %150 : vector<1x128xf32>
    %153 = arith.divf %151, %152 : vector<1x128xf32>
    %154 = vector.broadcast %153 : vector<1x128xf32> to vector<16x128xf32>
    %155 = arith.mulf %154, %107 : vector<16x128xf32>
    %156 = arith.addf %155, %61 : vector<16x128xf32>
    %c0_58 = arith.constant 0 : index
    %c0_59 = arith.constant 0 : index
    %c0_60 = arith.constant 0 : index
    %157 = vector.load %arg15[%c0_58, %c0_59, %c0_60] : memref<1x16x128xf32, #tpu.memory_space<vmem>>, vector<1x16x128xf32>
    %158 = vector.shape_cast %157 : vector<1x16x128xf32> to vector<16x128xf32>
    %159 = vector.shape_cast %156 : vector<16x128xf32> to vector<1x16x128xf32>
    tpu.vector_store %arg15[%c0_58, %c0_59, %c0_60], %159 {strides = array<i32>} : memref<1x16x128xf32, #tpu.memory_space<vmem>>, vector<1x16x128xf32>,
    return
  }
  func.func @transform_0(%arg0: i32) -> (i32, i32, i32) {
    %c0_i32 = arith.constant 0 : i32
    %c0_i32_0 = arith.constant 0 : i32
    %c0_i32_1 = arith.constant 0 : i32
    return %arg0, %c0_i32, %c0_i32_0 : i32, i32, i32
  }
  func.func @transform_1(%arg0: i32) -> (i32, i32) {
    %c0_i32 = arith.constant 0 : i32
    %c0_i32_0 = arith.constant 0 : i32
    %c0_i32_1 = arith.constant 0 : i32
    return %c0_i32, %c0_i32_0 : i32, i32
  }
  func.func @transform_2(%arg0: i32) -> (i32, i32) {
    %c0_i32 = arith.constant 0 : i32
    %c0_i32_0 = arith.constant 0 : i32
    %c0_i32_1 = arith.constant 0 : i32
    return %c0_i32, %c0_i32_0 : i32, i32
  }
  func.func @transform_3(%arg0: i32) -> (i32, i32) {
    %c0_i32 = arith.constant 0 : i32
    %c0_i32_0 = arith.constant 0 : i32
    %c0_i32_1 = arith.constant 0 : i32
    return %c0_i32, %c0_i32_0 : i32, i32
  }
  func.func @transform_4(%arg0: i32) -> (i32, i32) {
    %c0_i32 = arith.constant 0 : i32
    %c0_i32_0 = arith.constant 0 : i32
    %c0_i32_1 = arith.constant 0 : i32
    return %c0_i32, %c0_i32_0 : i32, i32
  }
  func.func @transform_5(%arg0: i32) -> (i32, i32) {
    %c0_i32 = arith.constant 0 : i32
    %c0_i32_0 = arith.constant 0 : i32
    %c0_i32_1 = arith.constant 0 : i32
    return %c0_i32, %c0_i32_0 : i32, i32
  }
  func.func @transform_6(%arg0: i32) -> (i32, i32) {
    %c0_i32 = arith.constant 0 : i32
    %c0_i32_0 = arith.constant 0 : i32
    %c0_i32_1 = arith.constant 0 : i32
    return %c0_i32, %c0_i32_0 : i32, i32
  }
  func.func @transform_7(%arg0: i32) -> (i32, i32) {
    %c0_i32 = arith.constant 0 : i32
    %c0_i32_0 = arith.constant 0 : i32
    %c0_i32_1 = arith.constant 0 : i32
    return %c0_i32, %c0_i32_0 : i32, i32
  }
  func.func @transform_8(%arg0: i32) -> (i32, i32) {
    %c0_i32 = arith.constant 0 : i32
    %c0_i32_0 = arith.constant 0 : i32
    %c0_i32_1 = arith.constant 0 : i32
    return %c0_i32, %c0_i32_0 : i32, i32
  }
  func.func @transform_9(%arg0: i32) -> (i32, i32) {
    %c0_i32 = arith.constant 0 : i32
    %c0_i32_0 = arith.constant 0 : i32
    %c0_i32_1 = arith.constant 0 : i32
    return %c0_i32, %c0_i32_0 : i32, i32
  }
  func.func @transform_10(%arg0: i32) -> (i32, i32) {
    %c0_i32 = arith.constant 0 : i32
    %c0_i32_0 = arith.constant 0 : i32
    %c0_i32_1 = arith.constant 0 : i32
    return %c0_i32, %c0_i32_0 : i32, i32
  }
  func.func @transform_11(%arg0: i32) -> (i32, i32) {
    %c0_i32 = arith.constant 0 : i32
    %c0_i32_0 = arith.constant 0 : i32
    %c0_i32_1 = arith.constant 0 : i32
    return %c0_i32, %c0_i32_0 : i32, i32
  }
  func.func @transform_12(%arg0: i32) -> (i32, i32) {
    %c0_i32 = arith.constant 0 : i32
    %c0_i32_0 = arith.constant 0 : i32
    %c0_i32_1 = arith.constant 0 : i32
    return %c0_i32, %c0_i32_0 : i32, i32
  }
  func.func @transform_13(%arg0: i32) -> (i32, i32) {
    %c0_i32 = arith.constant 0 : i32
    %c0_i32_0 = arith.constant 0 : i32
    %c0_i32_1 = arith.constant 0 : i32
    return %c0_i32, %c0_i32_0 : i32, i32
  }
  func.func @transform_14(%arg0: i32) -> (i32, i32, i32) {
    %c0_i32 = arith.constant 0 : i32
    %c0_i32_0 = arith.constant 0 : i32
    %c0_i32_1 = arith.constant 0 : i32
    return %arg0, %c0_i32, %c0_i32_0 : i32, i32, i32
  }
}

</mosaic_0001>

<bundles_post_ra>
// kernel: tpu_custom_call.1
= control target key start
LH: loop header
LB: loop body
LE: loop exit
PB: predicated region body
PF: predicated region fallthrough
CT: control target
= control target key end

     0   :  { %19 = vsyncpa [#allocation3], 0  ;;  %s2929_s0 = inlined_call_operand.vmem [shape: f32[2,16,256], index: 0, kind: input, shape index: {}]   ;;  %s2930_s1 = inlined_call_operand.vmem [shape: f32[16,1], index: 1, kind: input, shape index: {}]   ;;  %s2931_s2 = inlined_call_operand.vmem [shape: f32[16,1], index: 2, kind: input, shape index: {}]   ;;  %s2932_s3 = inlined_call_operand.vmem [shape: f32[16,48], index: 3, kind: input, shape index: {}]   ;;  %s2933_s4 = inlined_call_operand.vmem [shape: f32[16,1], index: 4, kind: input, shape index: {}]   ;;  %s2934_s5 = inlined_call_operand.vmem [shape: f32[16,1], index: 5, kind: input, shape index: {}]   ;;  %s2935_s6 = inlined_call_operand.vmem [shape: f32[16,48], index: 6, kind: input, shape index: {}]   ;;  %s2936_s7 = inlined_call_operand.vmem [shape: f32[3,256], index: 7, kind: input, shape index: {}]   ;;  %s2937_s8 = inlined_call_operand.hbm [shape: f32[256,128], index: 8, kind: input, shape index: {}]   ;;  %s2938_s9 = inlined_call_operand.vmem [shape: f32[4,16], index: 9, kind: input, shape index: {}]   ;;  %s2939_s10 = inlined_call_operand.vmem [shape: f32[16,4], index: 10, kind: input, shape index: {}]   ;;  %s2940_s11 = inlined_call_operand.vmem [shape: f32[4,128], index: 11, kind: input, shape index: {}]   ;;  %s2941_s12 = inlined_call_operand.vmem [shape: f32[7,128], index: 12, kind: input, shape index: {}]   ;;  %s2942_s13 = inlined_call_operand.vmem [shape: f32[1,14], index: 13, kind: input, shape index: {}]   ;;  %s2943_s14 = inlined_call_operand.hbm [shape: f32[2,16,128], index: 14, kind: output, shape index: {}]  }
   0x1   :  { %20 = vsyncpa [#allocation4], 0 }
   0x2   :  { %22 = vsyncpa [#allocation4 + $0x1], 0  ;;  %s2444_s29 = smov 0   ;;  %s2446_s30 = smov 0  }
   0x3   :  { %s2448_s15 = smov 0   ;;  %s2450_s16 = smov 0  }
   0x4 LB: > { %2954 = sst [smem:[#allocation8_spill]] %s2337_s15  ;;  %s2465_s17 = sadd.s32 4294967295, %s2341_s16   ;;  %s2341_s16 = sphi %s2450_s16, %s2970_s16   ;;  %s2337_s15 = sphi %s2448_s15, %s2972_s15   ;;  %s2333_s30 = sphi %s2446_s30, %s2974_s30   ;;  %s2329_s29 = sphi %s2444_s29, %s2973_s29  }
   0x5   : > { %s1870_s18 = sadd.s32 4294967294, %s2341_s16   ;;  %s2469_s19 = sadd.s32 1, %s2341_s16  }
   0x6   : > { %2955 = sst [smem:[#allocation9_spill]] %s2469_s19  ;;  %s334_s20 = sadd.s32 1, %s2337_s15 }
   0x7   : > { %s331_s21 = ssub.s32 %s2341_s16, %s2469_s19  ;;  %p344_p0 = scmp.ne.s32.totalorder %s2337_s15, %s2333_s30 }
   0x8   : > { %p332_p1 = scmp.eq.s32.totalorder %s331_s21, 0  ;;  %p345_p2 = scmp.eq.s32.totalorder %s2465_s17, 1 }
   0x9   : > { %p350_p3 = scmp.ne.s32.totalorder %s2333_s30, %s2329_s29  ;;  %p351_p4 = scmp.eq.s32.totalorder %s1870_s18, 1 }
   0xa   : > { %s2480_s22 = scalar_select %p332_p1, %s2337_s15, %s334_s20  }
   0xb   : > { %p2482_p5 = por %p345_p2, %p344_p0  ;;  %p2486_p6 = por %p351_p4, %p350_p3 }
   0xc   : > { %2956 = sst [smem:[#allocation10_spill]] %s2480_s22  ;;  %p1871_p7 = scmp.ge.s32.totalorder %s2341_s16, 1 }
   0xd   : > { %s2957_s23 = scalar_select %p2482_p5, 1, 0 }
   0xe   : > { %s2958_s24 = scalar_select %p2486_p6, 1, 0 }
   0xf   : > { %p358_p8 = scmp.lt.s32.totalorder %s2341_s16, 3  ;;  %p2948_p9 = scmp.eq.s32.totalorder %s2465_s17, 0 }
  0x10   : > { %2959 = sst [smem:[#allocation11_spill]] %s2958_s24  ;;  %s2343_s26 = smov [#allocation2]  }
  0x11   : > { %p2493_p10 = pnand %p1871_p7, %p358_p8  ;;  %s391_s27 = sshll.u32 %s2343_s26, 4  ;;  %s392_s27 = int_to_ptr.vmem [resolvable:$true] %s391_s27 }
  0x12   : > { %s2247_s21 = scalar_lea.hbm %s2937_s8, 4096 }
  0x13   : > { %s2960_s25 = scalar_select %p2493_p10, 1, 0 }
  0x14   : > { %p2051_p11 = pneg %p2493_p10  ;;  %p2248_p13 = scmp.ne.s32.totalorder %s2937_s8, %s2247_s21 }
  0x15   : > { %p2254_p3 = scmp.lt.u32.totalorder %s2247_s21, %s2937_s8 }
  0x16   : > { %p2501_p12 = pnand %p2948_p9, %p2051_p11 }
  0x18   : > { %p2249_p0 = pneg %p2501_p12 }
  0x1a   : > { %p2250_p1 = pnand %p2249_p0, %p2248_p13 }
  0x1c   : > { %p2251_p2 = pneg %p2250_p1 }
  0x1e   : > { %p2256_p4 = pnand %p2254_p3, %p2251_p2 }
  0x20   : > { %2259 = shalt.err (!%p2256_p4)
}
  0x21   : > { %s2260_s24 = scalar_lea.vmem %s392_s27, 4096  ;;  %p2268_p9 = scmp.lt.s32.totalorder %s392_s27, %s392_s27 }
  0x22   : > { %p2261_p7 = scmp.ne.s32.totalorder %s392_s27, %s2260_s24  ;;  %p2269_p6 = scmp.lt.s32.totalorder %s2260_s24, %s2260_s24 }
  0x24   : > { %p2263_p8 = pnand %p2261_p7, %p2249_p0  ;;  %p2270_p5 = por %p2269_p6, %p2268_p9 }
  0x26   : > { %p2264_p11 = pneg %p2263_p8 }
  0x28   : > { %p2271_p10 = pnand %p2270_p5, %p2264_p11 }
  0x2a   : > { %2274 = shalt.err (!%p2271_p10)
}
  0x2b   : > { %s2344_s15 = smov 128   ;;  %s2345_s22 = smov 8  }
  0x2c   : > { %2054 = dma.hbm_to_vmem [thread:$0]  (!%p2501_p12), %s2937_s8, 4096, %s392_s27, [#allocation3], %s2344_s15, %s2344_s15, %s2345_s22  }
  0x2d   : > { %p2962_p13 = scmp.ne.s32.totalorder %s2960_s25, 0 }
  0x2e   : > { %p2963_p1 = scmp.eq.s32.totalorder (!%p2962_p13), %s2465_s17, 0 }
  0x2f   : > { %430 = sbr.rel (%p2962_p13) target bundleno = 3073 (0xc01), region = 76 }
  0x36   : > { %2320 = dma.done.wait (%p2963_p1), [#allocation3], 4096   ;;  %p2964_p0 = pmov %p2963_p1 }
  0x37   : > { %v548_v0 = vlaneseq  ;;  %v2346_v1 = vmov 0   ;;  %v501_v5 = vld [vmem:[%s2931_s2] sm:$0xff]  ;;  %v502_v7 = vld [vmem:[%s2931_s2 + $0x8] sm:$0xff]  ;;  %s2347_s20 = smov 1   ;;  %p476_p5 = scmp.lt.s32.totalorder %s2465_s17, 1  ;;  %vm534_vm0 = vcmask 7168  }
  0x38   : > { %2322 = vsyncadd (%p2964_p0), [#allocation3], 4294963200  ;;  %2120 = vset.pattern.permute.xlu1 %v2346_v1  ;;  %2119 = vset.pattern.permute.xlu0 %v2346_v1  ;;  %v485_v6 = vld [vmem:[%s2930_s1] sm:$0xff]  ;;  %v486_v8 = vld [vmem:[%s2930_s1 + $0x8] sm:$0xff]  ;;  %s2951_s21 = smov 2   ;;  %vm628_vm1 = vcmask 15360  }
  0x39   : > { %v2527_v2 = vshrl.u32 %v548_v0, 7  ;;  %505 = vperm.xlu1 %2120, %v501_v5   ;;  %489 = vperm.xlu0 %2119, %v485_v6   ;;  %v2548_v9 = vld [vmem:[%s2936_s7] sm:$0x77]  ;;  %s477_s19 = scalar_select %p476_p5, %s2465_s17, 1  ;;  %vm657_vm2 = vcmask 1039360   ;;  %vm684_vm3 = vcmask 1031168  }
  0x3a   : > { %s2952_s26 = smov 127   ;;  %s2351_s15 = smov 126   ;;  %vm695_vm4 = vcmask 392192   ;;  %vm1157_vm5 = vcmask 261120   ;;  %vm1189_vm6 = vcmask 523520   ;;  %vm1210_vm7 = vcmask 785920  }
  0x3b   : > { %v2530_v3 = vsub.s32 1, %v2527_v2  ;;  %v576_v4 = vsub.s32 5, %v2527_v2  ;;  %s1900_s24 = sshll.u32 %s477_s19, 5  ;;  %v610_v22 = vsub.s32 6, %v2527_v2  ;;  %v2572_v25 = vsub.s32 2, %v2527_v2  ;;  %s2965_s19 = smov 127  }
  0x3c   : > { %s2564_s28 = scalar_lea.vmem %s2929_s0, %s1900_s24  ;;  %v554_v40 = vsub.s32 4, %v2527_v2  ;;  %v2593_v43 = vsub.s32 0, %v2527_v2  ;;  %s2353_s22 = smov 64   ;;  %vm1231_vm8 = vcmask 1048320   ;;  %vm2356_vm9 = vmmov 0  }
  0x3d   : > { %v577_v10 = vrot.slane %v2548_v9, %v576_v4  ;;  %v573_v11 = vrot.slane %v2548_v9, %v2530_v3  ;;  %510 = vperm.xlu1 %2120, %v502_v7   ;;  %494 = vperm.xlu0 %2119, %v486_v8   ;;  %v481_v14 = vld [vmem:[%s2564_s28] sm:$0xff]  ;;  %v482_v15 = vld [vmem:[%s2564_s28 + $0x8] sm:$0xff]  ;;  %v483_v20 = vld [vmem:[%s2564_s28 + $0x10] sm:$0xff]  ;;  %v611_v32 = vrot.slane %v2548_v9, %v610_v22  ;;  %s2354_s18 = smov 32   ;;  %vm1242_vm10 = vcmask 23552   ;;  %s2359_s24 = smov 3  }
  0x3e   : > { %v484_v21 = vld [vmem:[%s2564_s28 + $0x18] sm:$0xff]  ;;  %v607_v35 = vrot.slane %v2548_v9, %v2572_v25  ;;  %v555_v44 = vrot.slane %v2548_v9, %v554_v40  ;;  %v551_v45 = vrot.slane %v2548_v9, %v2593_v43  ;;  %vm1245_vm11 = vcmask 31744   ;;  %s2360_s25 = smov 4   ;;  %s2362_s27 = smov 123  }
  0x3f   : > { %v587_v12 = vrot.slane %v577_v10, %v2530_v3  ;;  %v583_v13 = vrot.slane %v573_v11, %v2530_v3  ;;  %v621_v38 = vrot.slane %v611_v32, %v2572_v25  ;;  %vm1248_vm12 = vcmask 39936   ;;  %p2967_p9 = scmp.ne.s32.totalorder %s2957_s23, 0 }
  0x40   : > { %v617_v39 = vrot.slane %v607_v35, %v2572_v25  ;;  %v2601_v48 = vrot.slane %v555_v44, %v2593_v43  ;;  %v2614_v55 = vrot.slane %v551_v45, %v2593_v43  ;;  %vm1251_vm13 = vcmask 48128  }
  0x41   : > { %592 = vrot.lane.b32.xlu1 %v587_v12, %s2347_s20  ;;  %590 = vrot.lane.b32.xlu0 %v583_v13, %s2347_s20  ;;  %vm1254_vm14 = vcmask 56320   ;;  %vm1258_vm15 = vcmask 130048  }
  0xb8   : > { %v506_v16 = vpop.permute.xlu1 %505  ;;  %v490_v17 = vpop.permute.xlu0 %489 }
  0xb9   : > { %v497_v18 = vmul.f32 %v490_v17, %v481_v14  ;;  %v498_v19 = vmul.f32 %v490_v17, %v482_v15 }
  0xbb   : > { %v513_v23 = vadd.f32 %v506_v16, %v497_v18  ;;  %v514_v24 = vadd.f32 %v506_v16, %v498_v19 }
  0xbc   : > { %v495_v26 = vpop.permute.xlu0 %494  ;;  %v511_v31 = vpop.permute.xlu1 %510 }
  0xbd   : > { %v499_v27 = vmul.f32 %v495_v26, %v483_v20  ;;  %v500_v28 = vmul.f32 %v495_v26, %v484_v21  ;;  %v518_v29 = vmax.f32 %v514_v24, 0.0  ;;  %v517_v30 = vmax.f32 %v513_v23, 0.0 }
  0xbe   : > { %v2350_v20 = vmov 0.0  }
  0xbf   : > { %v515_v33 = vadd.f32 %v511_v31, %v499_v27  ;;  %v516_v34 = vadd.f32 %v511_v31, %v500_v28  ;;  %528 = vrot.lane.b32.xlu1 %v518_v29, %s2347_s20  ;;  %526 = vrot.lane.b32.xlu0 %v517_v30, %s2347_s20  ;;  %v779_v27 = vld [vmem:[%s2933_s4] sm:$0xff]  ;;  %v780_v30 = vld [vmem:[%s2933_s4 + $0x8] sm:$0xff] }
  0xc0   : > { %v2588_v41 = vpop.permute.xlu1 %592  ;;  %v2590_v42 = vpop.permute.xlu0 %590  ;;  %766 = vmatprep.mubr.f32.mxu1 %v2350_v20  ;;  %v795_v29 = vld [vmem:[%s2934_s5] sm:$0xff]  ;;  %v796_v31 = vld [vmem:[%s2934_s5 + $0x8] sm:$0xff] }
  0xc1   : > { %v520_v36 = vmax.f32 %v516_v34, 0.0  ;;  %v519_v37 = vmax.f32 %v515_v33, 0.0  ;;  %v2607_v50 = vsel %vm534_vm0, %v2590_v42, %v2588_v41 }
  0xc3   : > { %532 = vrot.lane.b32.xlu1 %v520_v36, %s2347_s20  ;;  %530 = vrot.lane.b32.xlu0 %v519_v37, %s2347_s20 }
  0xc7   : > { %626 = vrot.lane.b32.xlu1 %v621_v38, %s2951_s21  ;;  %624 = vrot.lane.b32.xlu0 %v617_v39, %s2951_s21  ;;  %s473_s21 = sand.u32 1, %s2333_s30  }
 0x131   : > { %v529_v46 = vpop.permute.xlu1 %528  ;;  %v527_v47 = vpop.permute.xlu0 %526 }
 0x132   : > { %v545_v49 = vsel %vm534_vm0, %v529_v46, 0.0  ;;  %v535_v51 = vsel %vm534_vm0, %v527_v47, %v529_v46  ;;  %v543_v52 = vsel %vm534_vm0, 0.0, %v527_v47 }
 0x133   : > { %v600_v53 = vmul.f32 %v2588_v41, %v545_v49  ;;  %v599_v54 = vmul.f32 %v2607_v50, %v535_v51  ;;  %v598_v56 = vmul.f32 %v2590_v42, %v543_v52  ;;  %v567_v63 = vmul.f32 %v2601_v48, %v535_v51 }
 0x134   : > { %v566_v7 = vmul.f32 %v2614_v55, %v543_v52 }
 0x135   : > { %v533_v57 = vpop.permute.xlu1 %532  ;;  %v531_v58 = vpop.permute.xlu0 %530  ;;  %v2121_v59 = vpack.i.bf16 %v600_v53, %v599_v54 }
 0x136   : > { %v546_v60 = vsel %vm534_vm0, %v533_v57, 0.0  ;;  %v536_v61 = vsel %vm534_vm0, %v531_v58, %v533_v57  ;;  %v544_v62 = vsel %vm534_vm0, 0.0, %v531_v58 }
 0x137   : > { %v603_v0 = vmul.f32 %v2588_v41, %v546_v60  ;;  %v601_v1 = vmul.f32 %v2590_v42, %v544_v62  ;;  %v602_v5 = vmul.f32 %v2607_v50, %v536_v61  ;;  %2122 = vrot.lane.b32.xlu0 %v2121_v59, %s2952_s26  ;;  %v569_v6 = vmul.f32 %v2601_v48, %v536_v61 }
 0x138   : > { %v568_v8 = vmul.f32 %v2614_v55, %v544_v62 }
 0x139   : > { %v2628_v9 = vpop.permute.xlu1 %626  ;;  %v2630_v10 = vpop.permute.xlu0 %624  ;;  %v2131_v11 = vpack.i.bf16 %v601_v1, %v598_v56  ;;  %v2126_v12 = vpack.i.bf16 %v603_v0, %v602_v5  ;;  %v1982_v13 = vpack.c.bf16 %v569_v6, %v567_v63 }
 0x13a   : > { %v2635_v14 = vsel %vm628_vm1, %v2630_v10, %v2628_v9  ;;  %v1984_v15 = vpack.c.bf16 %v568_v8, %v566_v7  ;;  %v638_v16 = vmul.f32 %v2628_v9, %v546_v60  ;;  %v635_v17 = vmul.f32 %v2628_v9, %v545_v49  ;;  %v693_v8 = vld [vmem:[%s2932_s3] sm:$0xff] }
 0x13b   : > { %2132 = vrot.lane.b32.xlu0 %v2131_v11, %s2952_s26  ;;  %2127 = vrot.lane.b32.xlu1 %v2126_v12, %s2952_s26  ;;  %v637_v18 = vmul.f32 %v2635_v14, %v536_v61  ;;  %v634_v19 = vmul.f32 %v2635_v14, %v535_v51  ;;  %v633_v24 = vmul.f32 %v2630_v10, %v543_v52  ;;  %v694_v11 = vld [vmem:[%s2932_s3 + $0x8] sm:$0xff]  ;;  %s2352_s26 = smov 96  }
 0x13c   : > { %1983 = vmatprep.subr.bf16.mxu1 %v1982_v13  ;;  %v636_v26 = vmul.f32 %v2630_v10, %v544_v62 }
 0x13d   : > { %1985 = vmatpush1.bf16.msra.mxu1 %v1984_v15  ;;  %v2141_v21 = vpack.i.bf16 %v638_v16, %v637_v18  ;;  %v2136_v23 = vpack.i.bf16 %v635_v17, %v634_v19 }
 0x13e   : > { %v2146_v28 = vpack.i.bf16 %v636_v26, %v633_v24 }
 0x13f   : > { %2142 = vrot.lane.b32.xlu0 %v2141_v21, %s2351_s15  ;;  %2137 = vrot.lane.b32.xlu1 %v2136_v23, %s2351_s15 }
 0x143   : > { %783 = vperm.xlu0 %2119, %v779_v27   ;;  %2147 = vrot.lane.b32.xlu1 %v2146_v28, %s2351_s15 }
 0x147   : > { %799 = vperm.xlu0 %2119, %v795_v29   ;;  %788 = vperm.xlu1 %2120, %v780_v30  }
 0x14b   : > { %804 = vperm.xlu1 %2120, %v796_v31  }
 0x1a9   : > { %v2123_v32 = vpop.permute.xlu0 %2122 }
 0x1aa   : > { %v2125_v33 = vunpack.i.h.bf16 %v2123_v32  ;;  %v2124_v34 = vunpack.i.l.bf16 %v2123_v32 }
 0x1ac   : > { %v659_v45 = vsel %vm657_vm2, %v2124_v34, %v2125_v33 }
 0x1ad   : > { %v2128_v35 = vpop.permute.xlu1 %2127  ;;  %v2133_v36 = vpop.permute.xlu0 %2132 }
 0x1ae   : > { %v2130_v37 = vunpack.i.h.bf16 %v2128_v35  ;;  %v2129_v38 = vunpack.i.l.bf16 %v2128_v35  ;;  %v2135_v39 = vunpack.i.h.bf16 %v2133_v36  ;;  %v2134_v44 = vunpack.i.l.bf16 %v2133_v36 }
 0x1b0   : > { %v661_v46 = vsel %vm657_vm2, %v2129_v38, %v2130_v37  ;;  %v658_v47 = vsel %vm657_vm2, %v2134_v44, %v2124_v34  ;;  %v660_v49 = vsel %vm657_vm2, %v2135_v39, %v2129_v38 }
 0x1b1   : > { %v2138_v51 = vpop.permute.xlu1 %2137  ;;  %v2143_v52 = vpop.permute.xlu0 %2142  ;;  %v1986_v53 = vpack.c.bf16 %v661_v46, %v659_v45  ;;  %v1988_v54 = vpack.c.bf16 %v660_v49, %v658_v47 }
 0x1b2   : > { %v2140_v56 = vunpack.i.h.bf16 %v2138_v51  ;;  %v2139_v57 = vunpack.i.l.bf16 %v2138_v51  ;;  %v2145_v58 = vunpack.i.h.bf16 %v2143_v52  ;;  %v2144_v59 = vunpack.i.l.bf16 %v2143_v52 }
 0x1b3   : > { %1987 = vmatprep.subr.bf16.mxu1 %v1986_v53 }
 0x1b4   : > { %1989 = vmatpush1.bf16.msra.mxu1 %v1988_v54  ;;  %v686_v60 = vsel %vm684_vm3, %v2139_v57, %v2140_v56  ;;  %v688_v61 = vsel %vm684_vm3, %v2144_v59, %v2145_v58 }
 0x1b5   : > { %v2148_v62 = vpop.permute.xlu1 %2147  ;;  %v1990_v63 = vpack.c.bf16 %v688_v61, %v686_v60 }
 0x1b6   : > { %v2150_v0 = vunpack.i.h.bf16 %v2148_v62  ;;  %v2149_v1 = vunpack.i.l.bf16 %v2148_v62 }
 0x1b7   : > { %1991 = vmatprep.subr.bf16.mxu1 %v1990_v63 }
 0x1b8   : > { %v685_v5 = vsel %vm684_vm3, %v2149_v1, %v2139_v57  ;;  %v687_v6 = vsel %vm684_vm3, %v2150_v0, %v2144_v59 }
 0x1b9   : > { %v1992_v7 = vpack.c.bf16 %v687_v6, %v685_v5 }
 0x1bb   : > { %1993 = vmatpush1.bf16.msra.mxu1 %v1992_v7 }
 0x1be   : > { %1879 = vmatmul.mubr.msk.f32.vlgmr.msra.gmra.mrb[0].mxu1 %vm695_vm4, %v693_v8 }
 0x1bf   : > { %772 = vmatprep.mubr.f32.mxu1 %v2350_v20 }
 0x1c2   : > { %1880 = vmatmul.mubr.msk.f32.gmra.mrb[2].mxu1 %vm695_vm4, %v694_v11  ;;  %v784_v12 = vpop.permute.xlu0 %783 }
 0x1c3   : > { %979 = vmatprep.mubr.f32.mxu1 %v2350_v20 }
 0x1c6   : > { %v789_v13 = vpop.permute.xlu1 %788  ;;  %v800_v18 = vpop.permute.xlu0 %799 }
 0x1ca   : > { %v805_v29 = vpop.permute.xlu1 %804 }
 0x291   : > { %v768_v15 = vpop.f32.mrb[0].mxu1 }
 0x292   : > { %v791_v16 = vmul.f32 %v784_v12, %v768_v15  ;;  %v770_v17 = vpop.f32.mrb[1].mxu1 }
 0x293   : > { %v792_v19 = vmul.f32 %v784_v12, %v770_v17 }
 0x294   : > { %v807_v21 = vadd.f32 %v800_v18, %v791_v16 }
 0x295   : > { %v808_v23 = vadd.f32 %v800_v18, %v792_v19  ;;  %v774_v24 = vpop.f32.mrb[2].mxu1 }
 0x296   : > { %v811_v26 = vmax.f32 %v807_v21, 0.0  ;;  %v793_v27 = vmul.f32 %v789_v13, %v774_v24  ;;  %v776_v28 = vpop.f32.mrb[3].mxu1 }
 0x297   : > { %v812_v30 = vmax.f32 %v808_v23, 0.0  ;;  %v794_v31 = vmul.f32 %v789_v13, %v776_v28 }
 0x298   : > { %v809_v32 = vadd.f32 %v805_v29, %v793_v27  ;;  %819 = vrot.lane.b32.xlu0 %v811_v26, %s2347_s20 }
 0x299   : > { %v810_v33 = vadd.f32 %v805_v29, %v794_v31  ;;  %821 = vrot.lane.b32.xlu1 %v812_v30, %s2347_s20 }
 0x29a   : > { %v813_v34 = vmax.f32 %v809_v32, 0.0 }
 0x29b   : > { %v814_v35 = vmax.f32 %v810_v33, 0.0 }
 0x29c   : > { %823 = vrot.lane.b32.xlu0 %v813_v34, %s2347_s20 }
 0x29d   : > { %825 = vrot.lane.b32.xlu1 %v814_v35, %s2347_s20 }
 0x30a   : > { %v820_v36 = vpop.permute.xlu0 %819 }
 0x30b   : > { %v822_v37 = vpop.permute.xlu1 %821  ;;  %v835_v47 = vsel %vm534_vm0, 0.0, %v820_v36 }
 0x30c   : > { %v827_v38 = vsel %vm534_vm0, %v820_v36, %v822_v37  ;;  %v837_v39 = vsel %vm534_vm0, %v822_v37, 0.0  ;;  %v839_v60 = vmul.f32 %v835_v47, %v2614_v55  ;;  %v843_v61 = vmul.f32 %v835_v47, %v2590_v42 }
 0x30d   : > { %v844_v44 = vmul.f32 %v827_v38, %v2607_v50  ;;  %v845_v45 = vmul.f32 %v837_v39, %v2588_v41  ;;  %v840_v56 = vmul.f32 %v827_v38, %v2601_v48  ;;  %v850_v0 = vmul.f32 %v827_v38, %v2635_v14 }
 0x30e   : > { %v824_v46 = vpop.permute.xlu0 %823  ;;  %v851_v5 = vmul.f32 %v837_v39, %v2628_v9 }
 0x30f   : > { %v836_v49 = vsel %vm534_vm0, 0.0, %v824_v46  ;;  %v826_v51 = vpop.permute.xlu1 %825  ;;  %v2151_v63 = vpack.i.bf16 %v845_v45, %v844_v44 }
 0x310   : > { %v841_v52 = vmul.f32 %v836_v49, %v2614_v55  ;;  %v846_v53 = vmul.f32 %v836_v49, %v2590_v42  ;;  %v828_v54 = vsel %vm534_vm0, %v824_v46, %v826_v51  ;;  %v838_v57 = vsel %vm534_vm0, %v826_v51, 0.0  ;;  %v908_v51 = vld [vmem:[%s2935_s6 + $0x8] sm:$0xff] }
 0x311   : > { %v842_v58 = vmul.f32 %v828_v54, %v2601_v48  ;;  %v847_v59 = vmul.f32 %v828_v54, %v2607_v50  ;;  %v848_v62 = vmul.f32 %v838_v57, %v2588_v41  ;;  %2152 = vrot.lane.b32.xlu0 %v2151_v63, %s2965_s19  ;;  %v853_v48 = vmul.f32 %v828_v54, %v2635_v14  ;;  %v1040_v54 = vld [vmem:[#allocation2] sm:$0xff]  ;;  %v1043_v63 = vld [vmem:[#allocation2 + $0x18] sm:$0xff] }
 0x312   : > { %v1996_v6 = vpack.c.bf16 %v841_v52, %v839_v60  ;;  %v2156_v7 = vpack.i.bf16 %v846_v53, %v843_v61  ;;  %v854_v50 = vmul.f32 %v838_v57, %v2628_v9  ;;  %v852_v41 = vmul.f32 %v836_v49, %v2630_v10  ;;  %v907_v49 = vld [vmem:[%s2935_s6] sm:$0xff]  ;;  %v1057_v53 = vld [vmem:[#allocation2 + $0x88] sm:$0xff] }
 0x313   : > { %v1994_v1 = vpack.c.bf16 %v842_v58, %v840_v56  ;;  %v2161_v8 = vpack.i.bf16 %v848_v62, %v847_v59  ;;  %v2166_v42 = vpack.i.bf16 %v851_v5, %v850_v0  ;;  %v849_v55 = vmul.f32 %v835_v47, %v2630_v10  ;;  %v1056_v52 = vld [vmem:[#allocation2 + $0x80] sm:$0xff]  ;;  %v1041_v57 = vld [vmem:[#allocation2 + $0x8] sm:$0xff]  ;;  %v1058_v58 = vld [vmem:[#allocation2 + $0x90] sm:$0xff] }
 0x314   : > { %v2171_v11 = vpack.i.bf16 %v854_v50, %v853_v48  ;;  %v2006_v56 = vpack.c.bf16 %v1057_v53, %v1056_v52  ;;  %v1059_v59 = vld [vmem:[#allocation2 + $0x98] sm:$0xff]  ;;  %v2008_v60 = vpack.c.bf16 %v1041_v57, %v1040_v54  ;;  %v1042_v62 = vld [vmem:[#allocation2 + $0x10] sm:$0xff]  ;;  %v1060_v0 = vld [vmem:[#allocation2 + $0xa0] sm:$0xff] }
 0x315   : > { %1995 = vmatprep.subr.bf16.mxu1 %v1994_v1  ;;  %2162 = vrot.lane.b32.xlu1 %v2161_v8, %s2965_s19  ;;  %v2176_v12 = vpack.i.bf16 %v852_v41, %v849_v55  ;;  %v2010_v61 = vpack.c.bf16 %v1059_v59, %v1058_v58  ;;  %v1061_v1 = vld [vmem:[#allocation2 + $0xa8] sm:$0xff]  ;;  %v2012_v5 = vpack.c.bf16 %v1043_v63, %v1042_v62  ;;  %v1062_v48 = vld [vmem:[#allocation2 + $0xb0] sm:$0xff]  ;;  %v1063_v50 = vld [vmem:[#allocation2 + $0xb8] sm:$0xff] }
 0x316   : > { %1997 = vmatpush1.bf16.msra.mxu1 %v1996_v6  ;;  %2157 = vrot.lane.b32.xlu0 %v2156_v7, %s2965_s19  ;;  %v2014_v6 = vpack.c.bf16 %v1061_v1, %v1060_v0  ;;  %v1044_v7 = vld [vmem:[#allocation2 + $0x20] sm:$0xff]  ;;  %v1045_v8 = vld [vmem:[#allocation2 + $0x28] sm:$0xff]  ;;  %v1046_v55 = vld [vmem:[#allocation2 + $0x30] sm:$0xff] }
 0x317   : > { %2007 = vmatprep.subr.bf16.mxu0 %v2006_v56  ;;  %v2016_v41 = vpack.c.bf16 %v1045_v8, %v1044_v7 }
 0x318   : > { %2009 = vmatpush3.bf16.msra.mxu0 %v2008_v60 }
 0x319   : > { %2167 = vrot.lane.b32.xlu1 %v2166_v42, %s2351_s15  ;;  %2011 = vmatprep.subr.bf16.mxu0 %v2010_v61  ;;  %v2018_v42 = vpack.c.bf16 %v1063_v50, %v1062_v48 }
 0x31a   : > { %2172 = vrot.lane.b32.xlu0 %v2171_v11, %s2351_s15  ;;  %v1047_v11 = vld [vmem:[#allocation2 + $0x38] sm:$0xff] }
 0x31c   : > { %2013 = vmatpush3.bf16.msra.mxu0 %v2012_v5 }
 0x31d   : > { %2177 = vrot.lane.b32.xlu1 %v2176_v12, %s2351_s15  ;;  %2015 = vmatprep.subr.bf16.mxu0 %v2014_v6  ;;  %v1064_v12 = vld [vmem:[#allocation2 + $0xc0] sm:$0xff] }
 0x320   : > { %2017 = vmatpush3.bf16.msra.mxu0 %v2016_v41 }
 0x321   : > { %2019 = vmatprep.subr.bf16.mxu0 %v2018_v42 }
 0x383   : > { %v2153_v14 = vpop.permute.xlu0 %2152 }
 0x384   : > { %v2155_v9 = vunpack.i.h.bf16 %v2153_v14  ;;  %v2154_v13 = vunpack.i.l.bf16 %v2153_v14  ;;  %v1065_v14 = vld [vmem:[#allocation2 + $0xc8] sm:$0xff] }
 0x386   : > { %v874_v23 = vsel %vm657_vm2, %v2154_v13, %v2155_v9  ;;  %v2020_v9 = vpack.c.bf16 %v1047_v11, %v1046_v55 }
 0x387   : > { %v2163_v15 = vpop.permute.xlu1 %2162 }
 0x388   : > { %v2165_v16 = vunpack.i.h.bf16 %v2163_v15  ;;  %v2164_v17 = vunpack.i.l.bf16 %v2163_v15  ;;  %v2158_v18 = vpop.permute.xlu0 %2157  ;;  %v1048_v15 = vld [vmem:[#allocation2 + $0x40] sm:$0xff]  ;;  %2021 = vmatpush3.bf16.msra.mxu0 %v2020_v9 }
 0x389   : > { %v2160_v19 = vunpack.i.h.bf16 %v2158_v18  ;;  %v2159_v21 = vunpack.i.l.bf16 %v2158_v18  ;;  %v1067_v18 = vld [vmem:[#allocation2 + $0xd8] sm:$0xff] }
 0x38a   : > { %v876_v10 = vsel %vm657_vm2, %v2164_v17, %v2165_v16  ;;  %v1049_v16 = vld [vmem:[#allocation2 + $0x48] sm:$0xff] }
 0x38b   : > { %v2168_v24 = vpop.permute.xlu1 %2167  ;;  %v1998_v26 = vpack.c.bf16 %v876_v10, %v874_v23  ;;  %v873_v27 = vsel %vm657_vm2, %v2159_v21, %v2154_v13  ;;  %v875_v28 = vsel %vm657_vm2, %v2160_v19, %v2164_v17  ;;  %v2022_v13 = vpack.c.bf16 %v1065_v14, %v1064_v12  ;;  %v1066_v17 = vld [vmem:[#allocation2 + $0xd0] sm:$0xff]  ;;  %v1051_v10 = vld [vmem:[#allocation2 + $0x58] sm:$0xff] }
 0x38c   : > { %v2170_v29 = vunpack.i.h.bf16 %v2168_v24  ;;  %v2169_v30 = vunpack.i.l.bf16 %v2168_v24  ;;  %v2000_v31 = vpack.c.bf16 %v875_v28, %v873_v27  ;;  %v2173_v32 = vpop.permute.xlu0 %2172  ;;  %v2024_v19 = vpack.c.bf16 %v1049_v16, %v1048_v15  ;;  %v1050_v23 = vld [vmem:[#allocation2 + $0x50] sm:$0xff]  ;;  %v1068_v24 = vld [vmem:[#allocation2 + $0xe0] sm:$0xff] }
 0x38d   : > { %1999 = vmatprep.subr.bf16.mxu1 %v1998_v26  ;;  %v2175_v33 = vunpack.i.h.bf16 %v2173_v32  ;;  %v2174_v34 = vunpack.i.l.bf16 %v2173_v32  ;;  %2023 = vmatprep.subr.bf16.mxu0 %v2022_v13  ;;  %v2026_v21 = vpack.c.bf16 %v1067_v18, %v1066_v17  ;;  %v1069_v26 = vld [vmem:[#allocation2 + $0xe8] sm:$0xff]  ;;  %v2028_v27 = vpack.c.bf16 %v1051_v10, %v1050_v23  ;;  %v1070_v32 = vld [vmem:[#allocation2 + $0xf0] sm:$0xff] }
 0x38e   : > { %v900_v35 = vsel %vm684_vm3, %v2169_v30, %v2170_v29  ;;  %2001 = vmatpush1.bf16.msra.mxu1 %v2000_v31  ;;  %2025 = vmatpush3.bf16.msra.mxu0 %v2024_v19  ;;  %v2030_v28 = vpack.c.bf16 %v1069_v26, %v1068_v24  ;;  %v1052_v29 = vld [vmem:[#allocation2 + $0x60] sm:$0xff] }
 0x38f   : > { %v2178_v36 = vpop.permute.xlu1 %2177  ;;  %v902_v39 = vsel %vm684_vm3, %v2174_v34, %v2175_v33  ;;  %2027 = vmatprep.subr.bf16.mxu0 %v2026_v21  ;;  %v1071_v33 = vld [vmem:[#allocation2 + $0xf8] sm:$0xff] }
 0x390   : > { %v2180_v37 = vunpack.i.h.bf16 %v2178_v36  ;;  %v2179_v38 = vunpack.i.l.bf16 %v2178_v36  ;;  %v2002_v44 = vpack.c.bf16 %v902_v39, %v900_v35  ;;  %v2034_v35 = vpack.c.bf16 %v1071_v33, %v1070_v32  ;;  %v1055_v36 = vld [vmem:[#allocation2 + $0x78] sm:$0xff] }
 0x392   : > { %v901_v45 = vsel %vm684_vm3, %v2180_v37, %v2174_v34  ;;  %v899_v46 = vsel %vm684_vm3, %v2179_v38, %v2169_v30  ;;  %2003 = vmatprep.subr.bf16.mxu1 %v2002_v44  ;;  %v1053_v30 = vld [vmem:[#allocation2 + $0x68] sm:$0xff]  ;;  %2029 = vmatpush3.bf16.msra.mxu0 %v2028_v27  ;;  %v1054_v34 = vld [vmem:[#allocation2 + $0x70] sm:$0xff] }
 0x393   : > { %v2004_v47 = vpack.c.bf16 %v901_v45, %v899_v46  ;;  %v2032_v31 = vpack.c.bf16 %v1053_v30, %v1052_v29  ;;  %2031 = vmatprep.subr.bf16.mxu0 %v2030_v28  ;;  %v2036_v37 = vpack.c.bf16 %v1055_v36, %v1054_v34  ;;  %v2355_v30 = vmov 0.0|0.0  }
 0x395   : > { %2005 = vmatpush1.bf16.msra.mxu1 %v2004_v47 }
 0x396   : > { %2033 = vmatpush3.bf16.msra.mxu0 %v2032_v31  ;;  %2038 = vmatprep.subr.bf16.mxu1 %v2355_v30 }
 0x397   : > { %2035 = vmatprep.subr.bf16.mxu0 %v2034_v35 }
 0x398   : > { %1881 = vmatmul.mubr.msk.f32.vlgmr.msra.gmra.mrb[4].mxu1 %vm695_vm4, %v907_v49 }
 0x399   : > { %985 = vmatprep.mubr.f32.mxu1 %v2350_v20 }
 0x39a   : > { %2037 = vmatpush3.bf16.msra.mxu0 %v2036_v37 }
 0x39c   : > { %1882 = vmatmul.mubr.msk.f32.gmra.mrb[6].mxu1 %vm695_vm4, %v908_v51  ;;  %vm1681_vm4 = vcmask 1041408  }
 0x39d   : > { %1962 = vmatprep.mubr.msk.f32.mxu1 %vm2356_vm9, %v2350_v20 }
 0x46b   : > { %v981_v38 = vpop.f32.mrb[4].mxu1 }
 0x46c   : > { %v983_v39 = vpop.f32.mrb[5].mxu1 }
 0x46d   : > { %v2181_v44 = vpack.i.bf16 %v981_v38, %v983_v39 }
 0x46f   : > { %2182 = vrot.lane.b32.xlu0 %v2181_v44, %s2965_s19  ;;  %v987_v45 = vpop.f32.mrb[6].mxu1 }
 0x470   : > { %v989_v46 = vpop.f32.mrb[7].mxu1 }
 0x471   : > { %v2186_v47 = vpack.i.bf16 %v987_v45, %v989_v46 }
 0x473   : > { %2187 = vrot.lane.b32.xlu1 %v2186_v47, %s2965_s19 }
 0x4e1   : > { %v2183_v49 = vpop.permute.xlu0 %2182 }
 0x4e2   : > { %v2185_v51 = vunpack.i.h.bf16 %v2183_v49  ;;  %v2184_v52 = vunpack.i.l.bf16 %v2183_v49 }
 0x4e4   : > { %v1028_v53 = vsel %vm657_vm2, %v2184_v52, 0.0  ;;  %v1016_v54 = vsel %vm657_vm2, %v2185_v51, %v2184_v52 }
 0x4e5   : > { %v2188_v56 = vpop.permute.xlu1 %2187  ;;  %v1033_v57 = vmax.f32 %v983_v39, %v1028_v53  ;;  %v1032_v58 = vmax.f32 %v981_v38, %v1016_v54 }
 0x4e6   : > { %v2190_v59 = vunpack.i.h.bf16 %v2188_v56  ;;  %v2189_v60 = vunpack.i.l.bf16 %v2188_v56 }
 0x4e7   : > { %1136 = vmatprep.mubr.f32.mxu0 %v1033_v57 }
 0x4e8   : > { %v1029_v61 = vsel %vm657_vm2, %v2189_v60, 0.0  ;;  %1137 = vmatmul.mubr.f32.vlgmr.msra.gmra.mrb[0].mxu0 %v1032_v58  ;;  %v1017_v62 = vsel %vm657_vm2, %v2190_v59, %v2189_v60 }
 0x4e9   : > { %v1035_v63 = vmax.f32 %v989_v46, %v1029_v61  ;;  %v1034_v0 = vmax.f32 %v987_v45, %v1017_v62 }
 0x4eb   : > { %1141 = vmatprep.mubr.f32.mxu0 %v1035_v63 }
 0x4ec   : > { %1142 = vmatmul.mubr.f32.gmra.mrb[2].mxu0 %v1034_v0 }
 0x5bb   : > { %v1934_v1 = vpop.f32.mrb[0].mxu0 }
 0x5bc   : > { %v1935_v5 = vpop.f32.mrb[1].mxu0 }
 0x5bd   : > { %v2734_v6 = vadd.f32 %v1935_v5, %v1934_v1 }
 0x5bf   : > { %1175 = vrot.lane.b32.xlu0 %v2734_v6, %s2352_s26  ;;  %v1937_v7 = vpop.f32.mrb[2].mxu0  ;;  %v1158_v50 = vsel %vm1157_vm5, %v2734_v6, 0.0  ;;  %v1167_v55 = vsel %vm1157_vm5, %v2734_v6, -inf  ;;  %v1190_v11 = vsel %vm1189_vm6, %v2734_v6, -inf  ;;  %v1211_v26 = vsel %vm1210_vm7, %v2734_v6, -inf }
 0x5c0   : > { %v1938_v8 = vpop.f32.mrb[3].mxu0  ;;  %v1232_v28 = vsel %vm1231_vm8, %v2734_v6, -inf }
 0x5c1   : > { %v2737_v48 = vadd.f32 %v1938_v8, %v1937_v7 }
 0x5c3   : > { %1196 = vrot.lane.b32.xlu0 %v2734_v6, %s2353_s22  ;;  %1177 = vrot.lane.b32.xlu1 %v2737_v48, %s2352_s26  ;;  %v1170_v41 = vsel %vm1157_vm5, %v2737_v48, -inf  ;;  %v1193_v42 = vsel %vm1189_vm6, %v2737_v48, -inf  ;;  %v1161_v12 = vsel %vm1157_vm5, %v2737_v48, 0.0  ;;  %v1214_v27 = vsel %vm1210_vm7, %v2737_v48, -inf  ;;  %s2966_s26 = smov 2  }
 0x5c4   : > { %v1235_v29 = vsel %vm1231_vm8, %v2737_v48, -inf  ;;  %vm1647_vm6 = vcmask 1022976   ;;  %vm1656_vm7 = vcmask 1014784   ;;  %vm1678_vm8 = vcmask 998400  }
 0x5c7   : > { %1217 = vrot.lane.b32.xlu0 %v2734_v6, %s2354_s18  ;;  %1198 = vrot.lane.b32.xlu1 %v2737_v48, %s2353_s22  ;;  %s2358_s22 = smov 5  }
 0x5cb   : > { %1219 = vrot.lane.b32.xlu1 %v2737_v48, %s2354_s18  ;;  %s2357_s18 = smov 124  }
 0x5e6   : > { %1159 = vadd.xlane.f32.xlu0 %v1158_v50 }
 0x5ea   : > { %1171 = vmax.xlane.f32.xlu0 %v1170_v41 }
 0x5ee   : > { %1194 = vmax.xlane.f32.xlu0 %v1193_v42 }
 0x5ef   : > { %1168 = vmax.xlane.f32.xlu1 %v1167_v55 }
 0x5f3   : > { %1191 = vmax.xlane.f32.xlu1 %v1190_v11 }
 0x5f7   : > { %1162 = vadd.xlane.f32.xlu1 %v1161_v12 }
 0x631   : > { %v1176_v14 = vpop.permute.xlu0 %1175 }
 0x632   : > { %v1181_v9 = vsel %vm1157_vm5, %v1176_v14, 0.0 }
 0x633   : > { %1182 = vadd.xlane.f32.xlu0 %v1181_v9 }
 0x635   : > { %v1197_v13 = vpop.permute.xlu0 %1196  ;;  %v1178_v15 = vpop.permute.xlu1 %1177 }
 0x636   : > { %v1184_v16 = vsel %vm1157_vm5, %v1178_v15, 0.0  ;;  %v1202_v17 = vsel %vm1157_vm5, %v1197_v13, 0.0  ;;  %v1257_v13 = vld [vmem:[%s2938_s9] sm:$0xf] }
 0x637   : > { %1185 = vadd.xlane.f32.xlu0 %v1184_v16  ;;  %1203 = vadd.xlane.f32.xlu1 %v1202_v17  ;;  %v1333_v15 = vld [vmem:[%s2939_s10] sm:$0xff] }
 0x639   : > { %v1218_v18 = vpop.permute.xlu0 %1217  ;;  %v1199_v19 = vpop.permute.xlu1 %1198 }
 0x63a   : > { %v1205_v21 = vsel %vm1157_vm5, %v1199_v19, 0.0  ;;  %v1223_v23 = vsel %vm1157_vm5, %v1218_v18, 0.0  ;;  %v1334_v19 = vld [vmem:[%s2939_s10 + $0x8] sm:$0xff] }
 0x63b   : > { %1206 = vadd.xlane.f32.xlu0 %v1205_v21  ;;  %1224 = vadd.xlane.f32.xlu1 %v1223_v23 }
 0x63d   : > { %v1220_v10 = vpop.permute.xlu1 %1219 }
 0x63e   : > { %v1226_v24 = vsel %vm1157_vm5, %v1220_v10, 0.0  ;;  %v1442_v10 = vld [vmem:[%s2940_s11] sm:$0xf]  ;;  %vm1667_vm5 = vcmask 1006592  }
 0x63f   : > { %1227 = vadd.xlane.f32.xlu0 %v1226_v24  ;;  %1212 = vmax.xlane.f32.xlu1 %v1211_v26 }
 0x643   : > { %1215 = vmax.xlane.f32.xlu0 %v1214_v27  ;;  %1233 = vmax.xlane.f32.xlu1 %v1232_v28 }
 0x647   : > { %1236 = vmax.xlane.f32.xlu0 %v1235_v29 }
 0x673   : > { %v1160_v31 = vpop.xlane.xlu0 %1159 }
 0x674   : > { %v1165_v46 = vmul.f32 0.03125, %v1160_v31 }
 0x677   : > { %v1172_v33 = vpop.xlane.xlu0 %1171 }
 0x67b   : > { %v1195_v35 = vpop.xlane.xlu0 %1194 }
 0x67c   : > { %v1169_v32 = vpop.xlane.xlu1 %1168 }
 0x680   : > { %v1192_v34 = vpop.xlane.xlu1 %1191 }
 0x684   : > { %v1163_v36 = vpop.xlane.xlu1 %1162 }
 0x685   : > { %v1166_v57 = vmul.f32 0.03125, %v1163_v36 }
 0x6c0   : > { %v1183_v37 = vpop.xlane.xlu0 %1182 }
 0x6c1   : > { %v1187_v44 = vmul.f32 0.03125, %v1183_v37 }
 0x6c3   : > { %v1238_v51 = vsel %vm534_vm0, %v1165_v46, %v1187_v44 }
 0x6c4   : > { %v1186_v38 = vpop.xlane.xlu0 %1185  ;;  %v1204_v39 = vpop.xlane.xlu1 %1203 }
 0x6c5   : > { %v1208_v45 = vmul.f32 0.03125, %v1204_v39  ;;  %v1188_v52 = vmul.f32 0.03125, %v1186_v38  ;;  %v1581_v38 = vsub.s32 3, %v2527_v2 }
 0x6c7   : > { %v1240_v54 = vsel %vm628_vm1, %v1238_v51, %v1208_v45  ;;  %v1239_v61 = vsel %vm534_vm0, %v1166_v57, %v1188_v52  ;;  %vm1341_vm0 = vcmask 1043456  }
 0x6c8   : > { %v1207_v47 = vpop.xlane.xlu0 %1206  ;;  %v1225_v49 = vpop.xlane.xlu1 %1224 }
 0x6c9   : > { %v1229_v53 = vmul.f32 0.03125, %v1225_v49  ;;  %v1209_v56 = vmul.f32 0.03125, %v1207_v47 }
 0x6cb   : > { %v1243_v58 = vsel %vm1242_vm10, %v1240_v54, %v1229_v53  ;;  %v1241_v63 = vsel %vm628_vm1, %v1239_v61, %v1209_v56  ;;  %vm1545_vm1 = vcmask 1040384  }
 0x6cc   : > { %v1228_v59 = vpop.xlane.xlu0 %1227  ;;  %v1213_v60 = vpop.xlane.xlu1 %1212  ;;  %v1246_v0 = vsel %vm1245_vm11, %v1243_v58, %v1169_v32 }
 0x6cd   : > { %v1230_v62 = vmul.f32 0.03125, %v1228_v59  ;;  %v1249_v8 = vsel %vm1248_vm12, %v1246_v0, %v1192_v34 }
 0x6ce   : > { %v1252_v42 = vsel %vm1251_vm13, %v1249_v8, %v1213_v60 }
 0x6cf   : > { %v1244_v1 = vsel %vm1242_vm10, %v1241_v63, %v1230_v62 }
 0x6d0   : > { %v1216_v5 = vpop.xlane.xlu0 %1215  ;;  %v1247_v7 = vsel %vm1245_vm11, %v1244_v1, %v1172_v33  ;;  %v1234_v41 = vpop.xlane.xlu1 %1233 }
 0x6d1   : > { %v1250_v50 = vsel %vm1248_vm12, %v1247_v7, %v1195_v35  ;;  %v1255_v12 = vsel %vm1254_vm14, %v1252_v42, %v1234_v41 }
 0x6d2   : > { %v1253_v55 = vsel %vm1251_vm13, %v1250_v50, %v1216_v5 }
 0x6d4   : > { %v1237_v11 = vpop.xlane.xlu0 %1236 }
 0x6d5   : > { %v1256_v14 = vsel %vm1254_vm14, %v1253_v55, %v1237_v11 }
 0x6d6   : > { %v2039_v9 = vpack.c.bf16 %v1256_v14, %v1255_v12 }
 0x6d8   : > { %2040 = vmatpush3.bf16.msra.mxu1 %v2039_v9 }
 0x6db   : > { %1963 = vmatmul.mubr.msk.f32.vlgmr.msra.gmra.mrb[8].mxu1 %vm1258_vm15, %v1257_v13 }
 0x6dc   : > { %1967 = vmatprep.mubr.msk.f32.mxu1 %vm1245_vm11, %v1333_v15 }
 0x7ae   : > { %v1328_v16 = vpop.f32.mrb[8].mxu1 }
 0x7af   : > { %v1332_v17 = vmax.f32 %v1328_v16, 0.0  ;;  %v1964_v18 = vpop.f32.mrb[9].mxu1 }
 0x7b1   : > { %1965 = vmatprep.subr.msk.mxu1 %vm1341_vm0, %v1332_v17 }
 0x7b2   : > { %1966 = vmatpush3.msk.msra.mxu1 %vm1341_vm0, %v1332_v17 }
 0x7b3   : > { %1968 = vmatmul.mubr.msk.f32.vlgmr.msra.gmra.mrb[10].mxu1 %vm1245_vm11, %v1334_v19  ;;  %1970 = vmatprep.subr.msk.mxu1 %vm1341_vm0, %v1442_v10 }
 0x7b4   : > { %1971 = vmatpush3.msk.msra.mxu1 %vm1341_vm0, %v1442_v10 }
 0x7b5   : > { %2041 = vmatprep.subr.bf16.mxu1 %v2355_v30  ;;  %v2803_v30 = vld [vmem:[%s2941_s12] sm:$0x7f] }
 0x7b6   : > { %v1562_v39 = vrot.slane %v2803_v30, %v2530_v3  ;;  %v1572_v44 = vrot.slane %v2803_v30, %v2572_v25  ;;  %v1582_v45 = vrot.slane %v2803_v30, %v1581_v38  ;;  %v1592_v3 = vrot.slane %v2803_v30, %v554_v40 }
 0x7b7   : > { %v1612_v0 = vrot.slane %v2803_v30, %v610_v22 }
 0x886   : > { %v1969_v21 = vpop.f32.mrb[10].mxu1 }
 0x887   : > { %1424 = vrot.lane.b32.xlu0 %v1969_v21, %s2357_s18  ;;  %v1411_v23 = vpop.f32.mrb[11].mxu1 }
 0x888   : > { %1422 = vrot.lane.b32.xlu1 %v1411_v23, %s2357_s18 }
 0x88b   : > { %1574 = vrot.lane.b32.xlu0 %v1572_v44, %s2966_s26  ;;  %v2838_v44 = vld [vmem:[%s2564_s28] sm:$0xff]  ;;  %s1876_s26 = sshll.u32 %s473_s21, 4 }
 0x88c   : > { %1564 = vrot.lane.b32.xlu1 %v1562_v39, %s2347_s20  ;;  %s2361_s20 = smov 6  }
 0x88f   : > { %1584 = vrot.lane.b32.xlu0 %v1582_v45, %s2359_s24 }
 0x893   : > { %1594 = vrot.lane.b32.xlu0 %v1592_v3, %s2360_s25  ;;  %v2846_v3 = vld [vmem:[%s2564_s28 + $0x10] sm:$0xff]  ;;  %s1901_s25 = sshll.u32 %s2465_s17, 8 }
 0x8f9   : > { %v1425_v24 = vpop.permute.xlu0 %1424 }
 0x8fa   : > { %v1429_v26 = vadd.f32 %v1969_v21, %v1425_v24  ;;  %v1423_v27 = vpop.permute.xlu1 %1422 }
 0x8fb   : > { %v1428_v28 = vadd.f32 %v1423_v27, %v1411_v23 }
 0x8fc   : > { %v1888_v29 = vmul.f32 -1.442695, %v1429_v26 }
 0x8fd   : > { %v1887_v31 = vmul.f32 -1.442695, %v1428_v28  ;;  %v1575_v1 = vpop.permute.xlu0 %1574 }
 0x8fe   : > { %2231 = vpow2.f32 %v1888_v29  ;;  %v1565_v5 = vpop.permute.xlu1 %1564 }
 0x8ff   : > { %2233 = vpow2.f32 %v1887_v31 }
 0x901   : > { %v1585_v7 = vpop.permute.xlu0 %1584 }
 0x905   : > { %v1595_v50 = vpop.permute.xlu0 %1594 }
 0x908   : > { %v2232_v32 = vpop.eup %2231 }
 0x909   : > { %v2234_v33 = vpop.eup %2233  ;;  %v1437_v34 = vadd.f32 1.0, %v2232_v32 }
 0x90a   : > { %v1436_v35 = vadd.f32 1.0, %v2234_v33 }
 0x90c   : > { %2235 = vrcp.f32 %v1436_v35 }
 0x90d   : > { %2237 = vrcp.f32 %v1437_v34 }
 0x916   : > { %v2236_v36 = vpop.eup %2235 }
 0x917   : > { %v2238_v37 = vpop.eup %2237  ;;  %1972 = vmatprep.mubr.msk.f32.mxu1 %vm1245_vm11, %v2236_v36 }
 0x918   : > { %1973 = vmatmul.mubr.msk.f32.vlgmr.msra.gmra.mrb[12].mxu1 %vm1245_vm11, %v2238_v37 }
 0x919   : > { %1979 = vmatprep.mubr.msk.f32.mxu1 %vm2356_vm9, %v2350_v20  ;;  %v1602_v20 = vrot.slane %v2803_v30, %v576_v4  ;;  %vm1684_vm9 = vcmask 1045504  }
 0x91b   : > { %1604 = vrot.lane.b32.xlu1 %v1602_v20, %s2358_s22  ;;  %v2841_v20 = vld [vmem:[%s2564_s28 + $0x8] sm:$0xff]  ;;  %s475_s22 = scalar_lea.vmem [#allocation5], %s1876_s26 }
 0x91c   : > { %v2221_v45 = vpack.i.bf16 %v2838_v44, %v2841_v20 }
 0x98d   : > { %v1605_v8 = vpop.permute.xlu1 %1604 }
 0x9eb   : > { %v1974_v25 = vpop.f32.mrb[12].mxu1 }
 0x9ec   : > { %v2820_v46 = vmul.f32 %v1974_v25, %v2737_v48  ;;  %v1518_v47 = vpop.f32.mrb[13].mxu1  ;;  %v2849_v25 = vld [vmem:[%s2564_s28 + $0x18] sm:$0xff]  ;;  %s2366_s28 = smov [#allocation5]  }
 0x9ed   : > { %v2823_v49 = vmul.f32 %v2734_v6, %v1518_v47  ;;  %v2226_v47 = vpack.i.bf16 %v2846_v3, %v2849_v25 }
 0x9ef   : > { %v1529_v4 = vadd.f32 %v2820_v46, %v2823_v49  ;;  %v1538_v51 = vmax.f32 %v2823_v49, %v2820_v46 }
 0x9f1   : > { %v1530_v52 = vrot.slane %v1529_v4, 4  ;;  %v1539_v53 = vrot.slane %v1538_v51, 4 }
 0x9f3   : > { %v1531_v54 = vadd.f32 %v1530_v52, %v1529_v4  ;;  %v1540_v40 = vmax.f32 %v1538_v51, %v1539_v53  ;;  %v1557_v52 = vrot.slane %v2803_v30, %v2593_v43 }
 0x9f5   : > { %v1532_v56 = vrot.slane %v1531_v54, 2  ;;  %v1541_v57 = vrot.slane %v1540_v40, 2 }
 0x9f7   : > { %v1533_v58 = vadd.f32 %v1532_v56, %v1531_v54  ;;  %v1542_v59 = vmax.f32 %v1540_v40, %v1541_v57 }
 0x9f9   : > { %v1534_v48 = vrot.slane %v1533_v58, 1  ;;  %v1543_v60 = vrot.slane %v1542_v59, 1 }
 0x9fb   : > { %v1535_v61 = vadd.f32 %v1534_v48, %v1533_v58  ;;  %v1544_v62 = vmax.f32 %v1542_v59, %v1543_v60 }
 0x9fd   : > { %v1537_v6 = vmul.f32 0.0625, %v1535_v61 }
 0x9ff   : > { %v1546_v63 = vsel %vm1545_vm1, %v1537_v6, %v1544_v62 }
 0xa00   : > { %1548 = vrot.lane.b32.xlu1 %v1546_v63, %s2359_s24  ;;  %s1796_s24 = sshll.u32 %s475_s22, 4  ;;  %s2881_s24 = int_to_ptr.vmem [resolvable:$true] %s1796_s24 }
 0xa01   : > { %s2275_s17 = scalar_lea.vmem %s2881_s24, 256 }
 0xa02   : > { %p2276_p6 = scmp.ne.s32.totalorder %s2881_s24, %s2275_s17 }
 0xa04   : > { %1614 = vrot.lane.b32.xlu1 %v1612_v0, %s2361_s20  ;;  %p2277_p10 = pnand %p2276_p6, %p2967_p9 }
 0xa06   : > { %p2278_p12 = pneg %p2277_p10 }
 0xa72   : > { %v1549_v41 = vpop.permute.xlu1 %1548 }
 0xa73   : > { %v1551_v42 = vsel %vm1242_vm10, 0.0, %v1549_v41  ;;  %v1552_v55 = vsel %vm1242_vm10, %v1549_v41, 0.0  ;;  %vm2365_vm10 = vmmov 1  }
 0xa74   : > { %v1597_v11 = vmul.f32 %v1595_v50, %v1551_v42  ;;  %v1598_v12 = vmul.f32 %v1595_v50, %v1552_v55  ;;  %v1577_v14 = vmul.f32 %v1575_v1, %v1551_v42  ;;  %v1578_v9 = vmul.f32 %v1575_v1, %v1552_v55  ;;  %vm2043_vm11 = vmpackc.low %vm1684_vm9, %vm2365_vm10 }
 0xa75   : > { %v1567_v13 = vmul.f32 %v1565_v5, %v1551_v42  ;;  %v1568_v2 = vmul.f32 %v1565_v5, %v1552_v55  ;;  %v1607_v15 = vmul.f32 %v1605_v8, %v1551_v42  ;;  %v1608_v22 = vmul.f32 %v1605_v8, %v1552_v55 }
 0xa76   : > { %v2191_v16 = vpack.i.bf16 %v1598_v12, %v1597_v11  ;;  %v1615_v17 = vpop.permute.xlu1 %1614  ;;  %v1631_v18 = vrot.slane %v1577_v14, 4  ;;  %v1632_v19 = vrot.slane %v1578_v9, 4  ;;  %v1587_v21 = vmul.f32 %v1585_v7, %v1551_v42 }
 0xa77   : > { %v1617_v23 = vmul.f32 %v1615_v17, %v1551_v42  ;;  %v1618_v10 = vmul.f32 %v1615_v17, %v1552_v55  ;;  %v1621_v24 = vrot.slane %v1567_v13, 6  ;;  %v1622_v26 = vrot.slane %v1568_v2, 6 }
 0xa78   : > { %2192 = vrot.lane.b32.xlu1 %v2191_v16, %s2357_s18  ;;  %v2201_v27 = vpack.i.bf16 %v1632_v19, %v1631_v18  ;;  %v1661_v28 = vrot.slane %v1607_v15, 6  ;;  %v1662_v29 = vrot.slane %v1608_v22, 6  ;;  %v1588_v31 = vmul.f32 %v1585_v7, %v1552_v55  ;;  %s2363_s18 = smov 125  }
 0xa79   : > { %v2196_v32 = vpack.i.bf16 %v1622_v26, %v1621_v24  ;;  %v1641_v33 = vrot.slane %v1587_v21, 2  ;;  %v1672_v35 = vrot.slane %v1617_v23, 4  ;;  %v1673_v36 = vrot.slane %v1618_v10, 4  ;;  %v1688_v24 = vld [vmem:[%s2942_s13] sm:$0x1] }
 0xa7a   : > { %2202 = vrot.lane.b32.xlu0 %v2201_v27, %s2351_s15  ;;  %v1642_v34 = vrot.slane %v1588_v31, 2  ;;  %v2206_v37 = vpack.i.bf16 %v1662_v29, %v1661_v28  ;;  %s2364_s15 = smov 122   ;;  %v1558_v57 = vmul.f32 %v1557_v52, %v1551_v42 }
 0xa7b   : > { %v2216_v39 = vpack.i.bf16 %v1673_v36, %v1672_v35 }
 0xa7c   : > { %2197 = vrot.lane.b32.xlu1 %v2196_v32, %s2965_s19  ;;  %v2211_v38 = vpack.i.bf16 %v1642_v34, %v1641_v33 }
 0xa7e   : > { %2207 = vrot.lane.b32.xlu0 %v2206_v37, %s2362_s27 }
 0xa80   : > { %2212 = vrot.lane.b32.xlu1 %v2211_v38, %s2363_s18  ;;  %s2886_s18 = scalar_lea.hbm %s2943_s14, %s1901_s25 }
 0xa82   : > { %2217 = vrot.lane.b32.xlu0 %v2216_v39, %s2364_s15  ;;  %s2888_s15 = scalar_lea.sflag [#allocation4], %s473_s21 }
 0xa84   : > { %2222 = vrot.lane.b32.xlu1 %v2221_v45, %s2965_s19 }
 0xa86   : > { %2227 = vrot.lane.b32.xlu0 %v2226_v47, %s2965_s19  ;;  %s2279_s19 = sshll.u32 %s2366_s28, 4  ;;  %s2280_s19 = int_to_ptr.vmem [resolvable:$false] %s2279_s19 }
 0xa87   : > { %s2281_s26 = scalar_lea.vmem %s2280_s19, 512  ;;  %p2282_p2 = scmp.lt.s32.totalorder %s2881_s24, %s2280_s19 }
 0xa88   : > { %p2283_p3 = scmp.lt.s32.totalorder %s2281_s26, %s2275_s17 }
 0xa8a   : > { %p2284_p4 = por %p2283_p3, %p2282_p2 }
 0xa8c   : > { %p2285_p7 = pnand %p2284_p4, %p2278_p12 }
 0xaea   : > { %v2193_v4 = vpop.permute.xlu1 %2192 }
 0xaeb   : > { %v2195_v6 = vunpack.i.h.bf16 %v2193_v4  ;;  %v2194_v62 = vunpack.i.l.bf16 %v2193_v4 }
 0xaec   : > { %v2203_v51 = vpop.permute.xlu0 %2202 }
 0xaed   : > { %v2205_v56 = vunpack.i.h.bf16 %v2203_v51  ;;  %v2204_v59 = vunpack.i.l.bf16 %v2203_v51  ;;  %v1657_v55 = vsel %vm1656_vm7, %v2194_v62, %v2195_v6 }
 0xaee   : > { %v2198_v53 = vpop.permute.xlu1 %2197 }
 0xaef   : > { %v2200_v54 = vunpack.i.h.bf16 %v2198_v53  ;;  %v2199_v40 = vunpack.i.l.bf16 %v2198_v53  ;;  %v1637_v8 = vsel %vm684_vm3, %v2204_v59, %v2205_v56  ;;  %vm1689_vm3 = vcmask 113664  }
 0xaf0   : > { %v2208_v58 = vpop.permute.xlu0 %2207 }
 0xaf1   : > { %v1627_v48 = vsel %vm657_vm2, %v2199_v40, %v2200_v54  ;;  %v2210_v60 = vunpack.i.h.bf16 %v2208_v58  ;;  %v2209_v61 = vunpack.i.l.bf16 %v2208_v58 }
 0xaf2   : > { %v2213_v63 = vpop.permute.xlu1 %2212  ;;  %v1682_v30 = vsel %vm1681_vm4, %v1558_v57, %v1627_v48 }
 0xaf3   : > { %v2215_v0 = vunpack.i.h.bf16 %v2213_v63  ;;  %v2214_v1 = vunpack.i.l.bf16 %v2213_v63  ;;  %v1668_v5 = vsel %vm1667_vm5, %v2209_v61, %v2210_v60  ;;  %v1683_v11 = vsel %vm1341_vm0, %v1682_v30, %v1637_v8 }
 0xaf4   : > { %v2218_v7 = vpop.permute.xlu0 %2217  ;;  %v1686_v14 = vsel %vm1681_vm4, %v1657_v55, %v1668_v5 }
 0xaf5   : > { %v1648_v50 = vsel %vm1647_vm6, %v2214_v1, %v2215_v0  ;;  %v2220_v41 = vunpack.i.h.bf16 %v2218_v7  ;;  %v2219_v42 = vunpack.i.l.bf16 %v2218_v7 }
 0xaf6   : > { %v2223_v12 = vpop.permute.xlu1 %2222  ;;  %v1685_v22 = vsel %vm1684_vm9, %v1683_v11, %v1648_v50 }
 0xaf7   : > { %v1679_v9 = vsel %vm1678_vm8, %v2219_v42, %v2220_v41  ;;  %v2225_v13 = vunpack.i.h.bf16 %v2223_v12  ;;  %v2224_v2 = vunpack.i.l.bf16 %v2223_v12 }
 0xaf8   : > { %v1687_v15 = vsel %vm1341_vm0, %v1686_v14, %v1679_v9  ;;  %v2228_v16 = vpop.permute.xlu0 %2227 }
 0xaf9   : > { %v2042_v17 = vpack.c.bf16 %v1687_v15, %v1685_v22  ;;  %v1030_v18 = vsel %vm657_vm2, %v2224_v2, 0.0  ;;  %v2230_v19 = vunpack.i.h.bf16 %v2228_v16  ;;  %v2229_v21 = vunpack.i.l.bf16 %v2228_v16 }
 0xafa   : > { %v1037_v23 = vmax.f32 %v2841_v20, %v1030_v18  ;;  %v1018_v10 = vsel %vm657_vm2, %v2225_v13, %v2224_v2 }
 0xafb   : > { %2044 = vmatpush3.bf16.msk.msra.mxu1 %vm2043_vm11, %v2042_v17  ;;  %v1031_v26 = vsel %vm657_vm2, %v2229_v21, 0.0  ;;  %v1036_v27 = vmax.f32 %v2838_v44, %v1018_v10  ;;  %v1019_v28 = vsel %vm657_vm2, %v2230_v19, %v2229_v21 }
 0xafc   : > { %v1039_v29 = vmax.f32 %v2849_v25, %v1031_v26  ;;  %1146 = vmatprep.mubr.f32.mxu0 %v1037_v23  ;;  %v1038_v31 = vmax.f32 %v2846_v3, %v1019_v28 }
 0xafd   : > { %1147 = vmatmul.mubr.f32.gmra.mrb[4].mxu0 %v1036_v27 }
 0xafe   : > { %1980 = vmatmul.mubr.msk.f32.vlgmr.msra.gmra.mrb[14].mxu1 %vm1689_vm3, %v1688_v24  ;;  %1151 = vmatprep.mubr.f32.mxu0 %v1039_v29 }
 0xb01   : > { %1152 = vmatmul.mubr.f32.gmra.mrb[6].mxu0 %v1038_v31 }
 0xbd0   : > { %v1940_v32 = vpop.f32.mrb[4].mxu0 }
 0xbd1   : > { %v1762_v33 = vpop.f32.mrb[14].mxu1  ;;  %v1941_v34 = vpop.f32.mrb[5].mxu0 }
 0xbd2   : > { %v1894_v35 = vmul.f32 -1.442695, %v1762_v33  ;;  %v1981_v36 = vpop.f32.mrb[15].mxu1  ;;  %v1942_v37 = vadd.f32 %v1941_v34, %v1940_v32 }
 0xbd4   : > { %2239 = vpow2.f32 %v1894_v35  ;;  %v1943_v38 = vpop.f32.mrb[6].mxu0 }
 0xbd5   : > { %v1944_v39 = vpop.f32.mrb[7].mxu0 }
 0xbd6   : > { %v1945_v44 = vadd.f32 %v1944_v39, %v1943_v38 }
 0xbde   : > { %v2240_v20 = vpop.eup %2239 }
 0xbdf   : > { %v1769_v45 = vadd.f32 1.0, %v2240_v20 }
 0xbe1   : > { %2241 = vrcp.f32 %v1769_v45 }
 0xbeb   : > { %v2242_v3 = vpop.eup %2241 }
 0xbec   : > { %v1775_v25 = vrot.slane %v2242_v3, %v2593_v43 }
 0xbee   : > { %v1776_v47 = vmul.f32 %v1775_v25, %v2823_v49  ;;  %v1777_v4 = vmul.f32 %v1775_v25, %v2820_v46 }
 0xbf0   : > { %v1778_v51 = vadd.f32 %v1942_v37, %v1776_v47  ;;  %v1779_v52 = vadd.f32 %v1945_v44, %v1777_v4 }
 0xbf2   : > { %1780 = vst [vmem:[%s475_s22] sm:$0xff] %v1778_v51  ;;  %1781 = vst [vmem:[%s475_s22 + $0x8] sm:$0xff] %v1779_v52 }
 0xbf3   : > { %2288 = shalt.err (!%p2285_p7)
}
 0xbf4   : > { %s2289_s21 = scalar_lea.hbm %s2886_s18, 256  ;;  %s2293_s20 = scalar_lea.hbm %s2943_s14, 512 }
 0xbf5   : > { %p2290_p8 = scmp.ne.s32.totalorder %s2886_s18, %s2289_s21  ;;  %p2294_p1 = scmp.lt.u32.totalorder %s2886_s18, %s2943_s14 }
 0xbf6   : > { %p2295_p0 = scmp.lt.u32.totalorder %s2293_s20, %s2289_s21  ;;  %p2297_p6 = scmp.lt.u32.totalorder %s2289_s21, %s2886_s18 }
 0xbf7   : > { %p2291_p11 = pnand %p2290_p8, %p2967_p9 }
 0xbf8   : > { %p2296_p5 = por %p2295_p0, %p2294_p1 }
 0xbf9   : > { %p2292_p13 = pneg %p2291_p11 }
 0xbfa   : > { %p2298_p10 = por %p2297_p6, %p2296_p5 }
 0xbfc   : > { %p2299_p12 = pnand %p2298_p10, %p2292_p13 }
 0xbfe   : > { %2302 = shalt.err (!%p2299_p12)
}
 0xbff   : > { %s2367_s17 = smov 128   ;;  %s2368_s19 = smov 8  }
 0xc00   : > { %2049 = dma.vmem_to_hbm [thread:$0]  (%p2967_p9), %s2881_s24, 256, %s2886_s18, %s2888_s15, %s2367_s17, %s2367_s17, %s2368_s19  }
 0xc01 PF: > { %s2968_s26 = sld [smem:[#allocation11_spill]]  ;;  %p2061_p2 = scmp.ge.s32.totalorder %s2341_s16, 2 }
 0xc02   : > { %s1811_s22 = sand.u32 1, %s2329_s29  }
 0xc03   : > { %s1812_s21 = scalar_lea.sflag [#allocation4], %s1811_s22 }
 0xc07   : > { %p2969_p3 = scmp.ne.s32.totalorder %s2968_s26, 0 }
 0xc09   : > { %p2056_p4 = pnand %p2061_p2, %p2969_p3 }
 0xc0b   : > { %2324 = dma.done.wait (!%p2056_p4), %s1812_s21, 256  }
 0xc0c   : > { %2326 = vsyncadd (!%p2056_p4), %s1812_s21, 4294967040  ;;  %s2970_s16 = sld [smem:[#allocation9_spill]]  ;;  %s2971_s25 = sld [smem:[#allocation8_spill]] }
 0xc0d   : > { %s2972_s15 = sld [smem:[#allocation10_spill]]  ;;  %s2973_s29 = smov %s2333_s30 }
 0xc12   : > { %p25_p7 = scmp.ge.s32.totalorder %s2970_s16, 4   ;;  %s2974_s30 = smov %s2971_s25 }
 0xc14   :  { %27 = sbr.rel (!%p25_p7) target bundleno = 4 (0x4), region = 116 }
 0xc1b   :  { %1817 = vsyncpa [#allocation3], 1 }
 0xc1c   :  { %1819 = vsyncpa [#allocation3 + $0x1], 1 }
 0xc1d   :  { %1820 = vsyncpa [#allocation4], 1 }
 0xc1e   :  { %1822 = vsyncpa [#allocation4 + $0x1], 1 }

</bundles_post_ra>
